<compile_context>
chip_gen: v6e
topology: v6e:2x2x1
jax: 0.10.0
libtpu: 0.0.40
codegen_flags: <defaults>
</compile_context>

<pallas_src>
import functools
import math

import jax
import jax.numpy as jnp
from jax.experimental import pallas as pl
from jax.experimental.pallas import tpu as pltpu


# ---------------------------------------------------------------------------
# Pallas kernel: one batch row-slab per grid step, full PNN forward fused.
# ---------------------------------------------------------------------------

def pnn_kernel(idx_ref, vcat_ref, w1_ref, w0_ref, wfm_ref, wemb_ref, b_ref,
               out_ref, *, num_fields, embed_dim):
    idx = idx_ref[...]                                   # (bB, F) int32
    bB = idx.shape[0]
    n = vcat_ref.shape[0]
    k = embed_dim

    # counts[b, j] = number of fields f with idx[b, f] == j (exact small ints).
    # Accumulate the per-field equality masks in int32; cast to f32 once.
    lane_ids = jax.lax.broadcasted_iota(jnp.int32, (bB, n), 1)
    counts_i = jnp.zeros((bB, n), jnp.int32)
    for f in range(num_fields):                          # static unroll, F small
        counts_i = counts_i + (idx[:, f:f + 1] == lane_ids).astype(jnp.int32)
    counts = counts_i.astype(jnp.float32)

    # Single 256-lane-wide MXU matmul against concat([V, V*V], axis=1).
    # Kept f32: the (sum V)^2 - sum V^2 difference below is cancellation-prone.
    sv = jnp.dot(counts, vcat_ref[...], preferred_element_type=jnp.float32)
    sum_v = sv[:, :k]                                    # (bB, K)
    sum_v2 = sv[:, k:]                                   # (bB, K)
    embed = sum_v

    # Linear part: VPU multiply + cross-lane reduce (XLU slot has slack).
    sum_w1 = jnp.sum(counts * w1_ref[...], axis=-1, keepdims=True)  # (bB, 1)
    linear_part = sum_w1 + w0_ref[0, 0]                  # scalar from SMEM

    fm = linear_part + 0.5 * (sum_v * sum_v - sum_v2)    # (bB, K)

    # Normalization hoisted to a per-row scale (column ops only, no full-tile
    # divide).  Clamp is applied to the sum-of-squares to match torch's
    # `sqrt(sum.clamp_min(1e-9))` exactly.
    emb_ss = jnp.sum(embed * embed, axis=-1, keepdims=True)
    fm_ss = jnp.sum(fm * fm, axis=-1, keepdims=True)
    scale = (jnp.sqrt(jnp.maximum(emb_ss, 1e-9))
             * jax.lax.rsqrt(jnp.maximum(fm_ss, 1e-9)))  # (bB, 1)
    fm = fm * scale

    # concat([fm, embed]) @ ln.W.T == fm @ Wt[:K] + embed @ Wt[K:]  (bf16 MXU,
    # f32 accumulation).
    out = (jnp.dot(fm.astype(jnp.bfloat16), wfm_ref[...],
                   preferred_element_type=jnp.float32)
           + jnp.dot(embed.astype(jnp.bfloat16), wemb_ref[...],
                     preferred_element_type=jnp.float32)
           + b_ref[...])
    out_ref[...] = out.astype(out_ref.dtype)


def make_pnn(batch, num_fields, vocab, k, *, block_b=None):
    # block_b=64 keeps >=2 grid steps per TensorCore at the demo batch (v7x has
    # 2 TCs), restoring compute/DMA overlap; MXU efficiency at M=64 is unchanged.
    if block_b is None:
        block_b = min(batch, 64)
    assert batch % block_b == 0 and block_b % 8 == 0
    grid = (batch // block_b,)

    kernel = functools.partial(pnn_kernel, num_fields=num_fields, embed_dim=k)
    const = lambda i: (0, 0)   # weights: same (whole-array) block every step

    # NOTE(scaling): the counts-matmul trick keeps the whole vocab resident in
    # VMEM and does O(block_b*N*2K) FLOPs.  Beyond N of a few thousand, add a
    # vocab grid axis (tile vcat along N, "arbitrary", VMEM accumulator) or
    # switch to a scalar-prefetched gather, and single-buffer the tables.
    in_specs = [
        pl.BlockSpec((block_b, num_fields), lambda i: (i, 0)),  # idx
        pl.BlockSpec((vocab, 2 * k), const),                    # [V | V*V]  f32
        pl.BlockSpec((1, vocab), const),                        # W1.T       f32
        pl.BlockSpec(memory_space=pltpu.MemorySpace.SMEM),      # W0 scalar
        pl.BlockSpec((k, k), const),                            # ln.W.T[:K] bf16
        pl.BlockSpec((k, k), const),                            # ln.W.T[K:] bf16
        pl.BlockSpec((1, k), const),                            # ln.b       f32
    ]
    return pl.pallas_call(
        kernel,
        out_shape=jax.ShapeDtypeStruct((batch, k), jnp.float32),
        grid=grid,
        in_specs=in_specs,
        out_specs=pl.BlockSpec((block_b, k), lambda i: (i, 0)),
        compiler_params=pltpu.CompilerParams(
            dimension_semantics=("parallel",),
            vmem_limit_bytes=64 * 1024 * 1024),
    )


# ---------------------------------------------------------------------------
# Pure-JAX reference (mirrors the PyTorch forward op-for-op)
# ---------------------------------------------------------------------------

def pnn_reference(idx, v_table, w1_table, w0, ln_w, ln_b):
    v_e = v_table[idx]                                   # (B, F, K)
    w1_e = w1_table[idx]                                 # (B, F, 1)
    embed = jnp.sum(v_e, axis=-2)                        # (B, K)
    linear = jnp.sum(w1_e, axis=-2) + w0                 # (B, 1)
    part1 = jnp.sum(v_e, axis=-2) ** 2
    part2 = jnp.sum(v_e ** 2, axis=-2)
    fm = linear + 0.5 * (part1 - part2)                  # (B, K)
    emb_n = jnp.sqrt(jnp.maximum(jnp.sum(embed ** 2, -1, keepdims=True), 1e-9))
    fm_n = jnp.sqrt(jnp.maximum(jnp.sum(fm ** 2, -1, keepdims=True), 1e-9))
    fm = fm / fm_n * emb_n
    cat = jnp.concatenate([fm, embed], axis=-1)          # (B, 2K)
    return cat @ ln_w.T + ln_b


# ---------------------------------------------------------------------------

if __name__ == "__main__":
    B, F, N, K = 256, 8, 128, 128   # batch, fields, vocab, embed dim (lane-dense)

    key = jax.random.PRNGKey(0)
    k_idx, k_v, k_w1, k_w0, k_lw, k_lb = jax.random.split(key, 6)

    idx = jax.random.randint(k_idx, (B, F), 0, N, dtype=jnp.int32)
    v_table = jax.random.normal(k_v, (N, K), jnp.float32)     # nn.Embedding(N, K)
    w1_table = jax.random.normal(k_w1, (N, 1), jnp.float32)   # nn.Embedding(N, 1)
    w0 = jax.random.normal(k_w0, (1,), jnp.float32)           # nn.Parameter randn(1)
    bound = 1.0 / math.sqrt(2 * K)
    ln_w = jax.random.uniform(k_lw, (K, 2 * K), jnp.float32, -bound, bound)
    ln_b = jax.random.uniform(k_lb, (K,), jnp.float32, -bound, bound)

    # One-time weight transforms for the kernel (pure parameter reshuffles).
    v_cat = jnp.concatenate([v_table, v_table * v_table], axis=1)  # (N, 2K) f32
    w1_row = w1_table.T                                            # (1, N)
    w0_smem = w0.reshape(1, 1)                                     # scalar -> SMEM
    wln_t = ln_w.T                                                 # (2K, K)
    wln_fm = wln_t[:K].astype(jnp.bfloat16)                        # (K, K) bf16
    wln_emb = wln_t[K:].astype(jnp.bfloat16)                       # (K, K) bf16
    bln = ln_b.reshape(1, K)

    fwd = make_pnn(B, F, N, K)
    out = fwd(idx, v_cat, w1_row, w0_smem, wln_fm, wln_emb, bln)
    out = jax.block_until_ready(out)

    ref = pnn_reference(idx, v_table, w1_table, w0, ln_w, ln_b)
    assert out.shape == (B, K)
    assert bool(jnp.all(jnp.isfinite(out)))
    err = float(jnp.max(jnp.abs(out - ref)))
    assert bool(jnp.allclose(out, ref, atol=2e-2, rtol=2e-2)), err
    print("KERNEL_OK")
</pallas_src>

<mosaic_0001>
module attributes {stable_mosaic.version = 11 : i64} {
  func.func @pnn_kernel(%arg0: i32, %arg1: memref<64x8xi32, #tpu.memory_space<vmem>>, %arg2: memref<128x256xf32, #tpu.memory_space<vmem>>, %arg3: memref<1x128xf32, #tpu.memory_space<vmem>>, %arg4: memref<1x1xf32, #tpu.memory_space<smem>>, %arg5: memref<128x128xbf16, #tpu.memory_space<vmem>>, %arg6: memref<128x128xbf16, #tpu.memory_space<vmem>>, %arg7: memref<1x128xf32, #tpu.memory_space<vmem>>, %arg8: memref<64x128xf32, #tpu.memory_space<vmem>>) attributes {dimension_semantics = [#tpu.dimension_semantics<parallel>], iteration_bounds = array<i64: 4>, scalar_prefetch = 0 : i64, scratch_operands = 0 : i64, tpu.core_type = #tpu.core_type<tc>, window_params = [{transform_indices = @transform_0, window_bounds = array<i64: 64, 8>}, {pipeline_mode = #tpu.pipeline_mode<synchronous>, transform_indices = @transform_1, window_bounds = array<i64: 128, 256>}, {pipeline_mode = #tpu.pipeline_mode<synchronous>, transform_indices = @transform_2, window_bounds = array<i64: 1, 128>}, {transform_indices = @transform_3, window_bounds = array<i64: 1, 1>}, {pipeline_mode = #tpu.pipeline_mode<synchronous>, transform_indices = @transform_4, window_bounds = array<i64: 128, 128>}, {pipeline_mode = #tpu.pipeline_mode<synchronous>, transform_indices = @transform_5, window_bounds = array<i64: 128, 128>}, {pipeline_mode = #tpu.pipeline_mode<synchronous>, transform_indices = @transform_6, window_bounds = array<i64: 1, 128>}, {transform_indices = @transform_7, window_bounds = array<i64: 64, 128>}]} {
    %c0 = arith.constant 0 : index
    %c0_0 = arith.constant 0 : index
    %0 = vector.load %arg1[%c0, %c0_0] : memref<64x8xi32, #tpu.memory_space<vmem>>, vector<64x8xi32>
    %1 = tpu.iota {dimensions = array<i32: 1>} : vector<64x128xi32>
    %c0_i32 = arith.constant 0 : i32
    %2 = vector.broadcast %c0_i32 : i32 to vector<64x128xi32>
    %3 = vector.extract_strided_slice %0 {offsets = [0, 0], sizes = [64, 1], strides = [1, 1]} : vector<64x8xi32> to vector<64x1xi32>
    %4 = vector.broadcast %3 : vector<64x1xi32> to vector<64x128xi32>
    %5 = arith.cmpi eq, %4, %1 : vector<64x128xi32>
    %6 = arith.extui %5 : vector<64x128xi1> to vector<64x128xi32>
    %7 = arith.addi %2, %6 : vector<64x128xi32>
    %8 = vector.extract_strided_slice %0 {offsets = [0, 1], sizes = [64, 1], strides = [1, 1]} : vector<64x8xi32> to vector<64x1xi32>
    %9 = vector.broadcast %8 : vector<64x1xi32> to vector<64x128xi32>
    %10 = arith.cmpi eq, %9, %1 : vector<64x128xi32>
    %11 = arith.extui %10 : vector<64x128xi1> to vector<64x128xi32>
    %12 = arith.addi %7, %11 : vector<64x128xi32>
    %13 = vector.extract_strided_slice %0 {offsets = [0, 2], sizes = [64, 1], strides = [1, 1]} : vector<64x8xi32> to vector<64x1xi32>
    %14 = vector.broadcast %13 : vector<64x1xi32> to vector<64x128xi32>
    %15 = arith.cmpi eq, %14, %1 : vector<64x128xi32>
    %16 = arith.extui %15 : vector<64x128xi1> to vector<64x128xi32>
    %17 = arith.addi %12, %16 : vector<64x128xi32>
    %18 = vector.extract_strided_slice %0 {offsets = [0, 3], sizes = [64, 1], strides = [1, 1]} : vector<64x8xi32> to vector<64x1xi32>
    %19 = vector.broadcast %18 : vector<64x1xi32> to vector<64x128xi32>
    %20 = arith.cmpi eq, %19, %1 : vector<64x128xi32>
    %21 = arith.extui %20 : vector<64x128xi1> to vector<64x128xi32>
    %22 = arith.addi %17, %21 : vector<64x128xi32>
    %23 = vector.extract_strided_slice %0 {offsets = [0, 4], sizes = [64, 1], strides = [1, 1]} : vector<64x8xi32> to vector<64x1xi32>
    %24 = vector.broadcast %23 : vector<64x1xi32> to vector<64x128xi32>
    %25 = arith.cmpi eq, %24, %1 : vector<64x128xi32>
    %26 = arith.extui %25 : vector<64x128xi1> to vector<64x128xi32>
    %27 = arith.addi %22, %26 : vector<64x128xi32>
    %28 = vector.extract_strided_slice %0 {offsets = [0, 5], sizes = [64, 1], strides = [1, 1]} : vector<64x8xi32> to vector<64x1xi32>
    %29 = vector.broadcast %28 : vector<64x1xi32> to vector<64x128xi32>
    %30 = arith.cmpi eq, %29, %1 : vector<64x128xi32>
    %31 = arith.extui %30 : vector<64x128xi1> to vector<64x128xi32>
    %32 = arith.addi %27, %31 : vector<64x128xi32>
    %33 = vector.extract_strided_slice %0 {offsets = [0, 6], sizes = [64, 1], strides = [1, 1]} : vector<64x8xi32> to vector<64x1xi32>
    %34 = vector.broadcast %33 : vector<64x1xi32> to vector<64x128xi32>
    %35 = arith.cmpi eq, %34, %1 : vector<64x128xi32>
    %36 = arith.extui %35 : vector<64x128xi1> to vector<64x128xi32>
    %37 = arith.addi %32, %36 : vector<64x128xi32>
    %38 = vector.extract_strided_slice %0 {offsets = [0, 7], sizes = [64, 1], strides = [1, 1]} : vector<64x8xi32> to vector<64x1xi32>
    %39 = vector.broadcast %38 : vector<64x1xi32> to vector<64x128xi32>
    %40 = arith.cmpi eq, %39, %1 : vector<64x128xi32>
    %41 = arith.extui %40 : vector<64x128xi1> to vector<64x128xi32>
    %42 = arith.addi %37, %41 : vector<64x128xi32>
    %43 = arith.sitofp %42 : vector<64x128xi32> to vector<64x128xf32>
    %c0_1 = arith.constant 0 : index
    %c0_2 = arith.constant 0 : index
    %44 = vector.load %arg2[%c0_1, %c0_2] : memref<128x256xf32, #tpu.memory_space<vmem>>, vector<128x256xf32>
    %cst = arith.constant dense<0.000000e+00> : vector<64x256xf32>
    %45 = tpu.matmul %43, %44, %cst {dimension_numbers = #tpu.dot_dimension_numbers<[1], [0], [0], [1], [0, 0, 1, 1], [], []>} : vector<64x128xf32>, vector<128x256xf32>, vector<64x256xf32> -> vector<64x256xf32>
    %46 = vector.extract_strided_slice %45 {offsets = [0, 0], sizes = [64, 128], strides = [1, 1]} : vector<64x256xf32> to vector<64x128xf32>
    %47 = vector.extract_strided_slice %45 {offsets = [0, 128], sizes = [64, 128], strides = [1, 1]} : vector<64x256xf32> to vector<64x128xf32>
    %c0_3 = arith.constant 0 : index
    %c0_4 = arith.constant 0 : index
    %48 = vector.load %arg3[%c0_3, %c0_4] : memref<1x128xf32, #tpu.memory_space<vmem>>, vector<1x128xf32>
    %49 = vector.broadcast %48 : vector<1x128xf32> to vector<64x128xf32>
    %50 = arith.mulf %43, %49 : vector<64x128xf32>
    %cst_5 = arith.constant dense<0.000000e+00> : vector<64xf32>
    %51 = vector.multi_reduction <add>, %50, %cst_5 [1] : vector<64x128xf32> to vector<64xf32>
    %52 = vector.shape_cast %51 : vector<64xf32> to vector<64x1xf32>
    %c0_6 = arith.constant 0 : index
    %c0_7 = arith.constant 0 : index
    %53 = memref.load %arg4[%c0_6, %c0_7] : memref<1x1xf32, #tpu.memory_space<smem>>
    %54 = vector.broadcast %53 : f32 to vector<64x1xf32>
    %55 = arith.addf %52, %54 : vector<64x1xf32>
    %56 = arith.mulf %46, %46 : vector<64x128xf32>
    %57 = arith.subf %56, %47 : vector<64x128xf32>
    %cst_8 = arith.constant 5.000000e-01 : f32
    %58 = vector.broadcast %cst_8 : f32 to vector<64x128xf32>
    %59 = arith.mulf %58, %57 : vector<64x128xf32>
    %60 = vector.broadcast %55 : vector<64x1xf32> to vector<64x128xf32>
    %61 = arith.addf %60, %59 : vector<64x128xf32>
    %62 = arith.mulf %46, %46 : vector<64x128xf32>
    %cst_9 = arith.constant dense<0.000000e+00> : vector<64xf32>
    %63 = vector.multi_reduction <add>, %62, %cst_9 [1] : vector<64x128xf32> to vector<64xf32>
    %64 = vector.shape_cast %63 : vector<64xf32> to vector<64x1xf32>
    %65 = arith.mulf %61, %61 : vector<64x128xf32>
    %cst_10 = arith.constant dense<0.000000e+00> : vector<64xf32>
    %66 = vector.multi_reduction <add>, %65, %cst_10 [1] : vector<64x128xf32> to vector<64xf32>
    %67 = vector.shape_cast %66 : vector<64xf32> to vector<64x1xf32>
    %cst_11 = arith.constant 9.99999971E-10 : f32
    %68 = vector.broadcast %cst_11 : f32 to vector<64x1xf32>
    %69 = arith.maximumf %64, %68 : vector<64x1xf32>
    %70 = math.sqrt %69 : vector<64x1xf32>
    %cst_12 = arith.constant 9.99999971E-10 : f32
    %71 = vector.broadcast %cst_12 : f32 to vector<64x1xf32>
    %72 = arith.maximumf %67, %71 : vector<64x1xf32>
    %73 = math.rsqrt %72 : vector<64x1xf32>
    %74 = arith.mulf %70, %73 : vector<64x1xf32>
    %75 = vector.broadcast %74 : vector<64x1xf32> to vector<64x128xf32>
    %76 = arith.mulf %61, %75 : vector<64x128xf32>
    %77 = arith.truncf %76 : vector<64x128xf32> to vector<64x128xbf16>
    %c0_13 = arith.constant 0 : index
    %c0_14 = arith.constant 0 : index
    %78 = vector.load %arg5[%c0_13, %c0_14] : memref<128x128xbf16, #tpu.memory_space<vmem>>, vector<128x128xbf16>
    %cst_15 = arith.constant dense<0.000000e+00> : vector<64x128xf32>
    %79 = tpu.matmul %77, %78, %cst_15 {dimension_numbers = #tpu.dot_dimension_numbers<[1], [0], [0], [1], [0, 0, 1, 1], [], []>} : vector<64x128xbf16>, vector<128x128xbf16>, vector<64x128xf32> -> vector<64x128xf32>
    %80 = arith.truncf %46 : vector<64x128xf32> to vector<64x128xbf16>
    %c0_16 = arith.constant 0 : index
    %c0_17 = arith.constant 0 : index
    %81 = vector.load %arg6[%c0_16, %c0_17] : memref<128x128xbf16, #tpu.memory_space<vmem>>, vector<128x128xbf16>
    %cst_18 = arith.constant dense<0.000000e+00> : vector<64x128xf32>
    %82 = tpu.matmul %80, %81, %cst_18 {dimension_numbers = #tpu.dot_dimension_numbers<[1], [0], [0], [1], [0, 0, 1, 1], [], []>} : vector<64x128xbf16>, vector<128x128xbf16>, vector<64x128xf32> -> vector<64x128xf32>
    %83 = arith.addf %79, %82 : vector<64x128xf32>
    %c0_19 = arith.constant 0 : index
    %c0_20 = arith.constant 0 : index
    %84 = vector.load %arg7[%c0_19, %c0_20] : memref<1x128xf32, #tpu.memory_space<vmem>>, vector<1x128xf32>
    %85 = vector.broadcast %84 : vector<1x128xf32> to vector<64x128xf32>
    %86 = arith.addf %83, %85 : vector<64x128xf32>
    %c0_21 = arith.constant 0 : index
    %c0_22 = arith.constant 0 : index
    %87 = vector.load %arg8[%c0_21, %c0_22] : memref<64x128xf32, #tpu.memory_space<vmem>>, vector<64x128xf32>
    tpu.vector_store %arg8[%c0_21, %c0_22], %86 {strides = array<i32>} : memref<64x128xf32, #tpu.memory_space<vmem>>, vector<64x128xf32>,
    return
  }
  func.func @transform_0(%arg0: i32) -> (i32, i32) {
    %c0_i32 = arith.constant 0 : i32
    %c0_i32_0 = arith.constant 0 : i32
    return %arg0, %c0_i32 : i32, i32
  }
  func.func @transform_1(%arg0: i32) -> (i32, i32) {
    %c0_i32 = arith.constant 0 : i32
    %c0_i32_0 = arith.constant 0 : i32
    %c0_i32_1 = arith.constant 0 : i32
    return %c0_i32, %c0_i32_0 : i32, i32
  }
  func.func @transform_2(%arg0: i32) -> (i32, i32) {
    %c0_i32 = arith.constant 0 : i32
    %c0_i32_0 = arith.constant 0 : i32
    %c0_i32_1 = arith.constant 0 : i32
    return %c0_i32, %c0_i32_0 : i32, i32
  }
  func.func @transform_3(%arg0: i32) -> (i32, i32) {
    %c0_i32 = arith.constant 0 : i32
    %c0_i32_0 = arith.constant 0 : i32
    %c0_i32_1 = arith.constant 0 : i32
    return %c0_i32, %c0_i32_0 : i32, i32
  }
  func.func @transform_4(%arg0: i32) -> (i32, i32) {
    %c0_i32 = arith.constant 0 : i32
    %c0_i32_0 = arith.constant 0 : i32
    %c0_i32_1 = arith.constant 0 : i32
    return %c0_i32, %c0_i32_0 : i32, i32
  }
  func.func @transform_5(%arg0: i32) -> (i32, i32) {
    %c0_i32 = arith.constant 0 : i32
    %c0_i32_0 = arith.constant 0 : i32
    %c0_i32_1 = arith.constant 0 : i32
    return %c0_i32, %c0_i32_0 : i32, i32
  }
  func.func @transform_6(%arg0: i32) -> (i32, i32) {
    %c0_i32 = arith.constant 0 : i32
    %c0_i32_0 = arith.constant 0 : i32
    %c0_i32_1 = arith.constant 0 : i32
    return %c0_i32, %c0_i32_0 : i32, i32
  }
  func.func @transform_7(%arg0: i32) -> (i32, i32) {
    %c0_i32 = arith.constant 0 : i32
    %c0_i32_0 = arith.constant 0 : i32
    return %arg0, %c0_i32 : i32, i32
  }
}

</mosaic_0001>

<bundles_post_ra>
// kernel: tpu_custom_call.1
= control target key start
LH: loop header
LB: loop body
LE: loop exit
PB: predicated region body
PF: predicated region fallthrough
CT: control target
= control target key end

     0   :  { %s2607_s0 = inlined_call_operand.vmem [shape: s32[256,8], index: 0, kind: input, shape index: {}]   ;;  %s2608_s1 = inlined_call_operand.vmem [shape: f32[128,256], index: 1, kind: input, shape index: {}]   ;;  %s2609_s2 = inlined_call_operand.vmem [shape: f32[1,128], index: 2, kind: input, shape index: {}]   ;;  %s2610_s3 = inlined_call_operand.<no memory space> [shape: f32[1,1], index: 3, kind: input, shape index: {}]   ;;  %s2611_s4 = inlined_call_operand.hbm [shape: bf16[128,128], index: 4, kind: input, shape index: {}]   ;;  %s2612_s5 = inlined_call_operand.hbm [shape: bf16[128,128], index: 5, kind: input, shape index: {}]   ;;  %s2613_s6 = inlined_call_operand.vmem [shape: f32[1,128], index: 6, kind: input, shape index: {}]   ;;  %s2614_s7 = inlined_call_operand.hbm [shape: f32[256,128], index: 7, kind: output, shape index: {}]  }
   0x1   :  { %12 = sst [smem:[#allocation2]] %s2610_s3 }
   0x2   :  { %13 = vsyncpa [#allocation4], 0 }
   0x3   :  { %14 = vsyncpa [#allocation7], 0 }
   0x4   :  { %15 = vsyncpa [#allocation5], 0 }
   0x5   :  { %17 = vsyncpa [#allocation5 + $0x1], 0  ;;  %s1924_s26 = smov 0   ;;  %s1926_s27 = smov 0  }
   0x6   :  { %s1928_s28 = smov 0   ;;  %s1930_s29 = smov 0  }
   0x7 LB: > { %s1945_s3 = sadd.s32 4294967295, %s1863_s29   ;;  %s1447_s30 = sadd.s32 4294967294, %s1863_s29   ;;  %s1863_s29 = sphi %s1930_s29, %s2628_s29   ;;  %s1859_s28 = sphi %s1928_s28, %s2627_s28   ;;  %s1855_s27 = sphi %s1926_s27, %s2626_s27   ;;  %s1851_s26 = sphi %s1924_s26, %s2625_s26  }
   0x8   : > { %s1949_s8 = sadd.s32 1, %s1863_s29   ;;  %s182_s9 = sadd.s32 1, %s1859_s28 }
   0x9   : > { %s179_s10 = ssub.s32 %s1863_s29, %s1949_s8  ;;  %p192_p0 = scmp.ne.s32.totalorder %s1859_s28, %s1855_s27 }
   0xa   : > { %p180_p1 = scmp.eq.s32.totalorder %s179_s10, 0  ;;  %p193_p2 = scmp.eq.s32.totalorder %s1945_s3, 3 }
   0xb   : > { %p198_p3 = scmp.ne.s32.totalorder %s1855_s27, %s1851_s26  ;;  %p199_p4 = scmp.eq.s32.totalorder %s1447_s30, 3 }
   0xc   : > { %s1960_s11 = scalar_select %p180_p1, %s1859_s28, %s182_s9  }
   0xd   : > { %p1962_p5 = por %p193_p2, %p192_p0  ;;  %p1966_p6 = por %p199_p4, %p198_p3 }
   0xe   : > { %p1448_p7 = scmp.ge.s32.totalorder %s1863_s29, 1  ;;  %p206_p8 = scmp.lt.s32.totalorder %s1863_s29, 5 }
   0xf   : > { %s2617_s13 = scalar_select %p1966_p6, 1, 0 }
  0x10   : > { %p2615_p9 = scmp.eq.s32.totalorder %s1945_s3, 0  ;;  %p1973_p10 = pnand %p1448_p7, %p206_p8 }
  0x11   : > { %s1865_s15 = smov [#allocation3]   ;;  %s1866_s18 = smov [#allocation6]  }
  0x12   : > { %s227_s16 = sshll.u32 %s1865_s15, 4  ;;  %p1580_p11 = pneg %p1973_p10  ;;  %s228_s16 = int_to_ptr.vmem [resolvable:$true] %s227_s16 }
  0x13   : > { %s240_s19 = sshll.u32 %s1866_s18, 4  ;;  %s1754_s20 = scalar_lea.vmem %s228_s16, 1024  ;;  %s241_s19 = int_to_ptr.vmem [resolvable:$true] %s240_s19 }
  0x14   : > { %p1981_p12 = pnand %p2615_p9, %p1580_p11  ;;  %p1755_p0 = scmp.ne.s32.totalorder %s228_s16, %s1754_s20 }
  0x15   : > { %p1762_p3 = scmp.lt.s32.totalorder %s228_s16, %s228_s16  ;;  %p1763_p4 = scmp.lt.s32.totalorder %s1754_s20, %s1754_s20 }
  0x16   : > { %p1745_p13 = pneg %p1981_p12 }
  0x17   : > { %p1764_p7 = por %p1763_p4, %p1762_p3 }
  0x18   : > { %p1757_p1 = pnand %p1755_p0, %p1745_p13 }
  0x1a   : > { %p1758_p2 = pneg %p1757_p1 }
  0x1c   : > { %p1765_p8 = pnand %p1764_p7, %p1758_p2 }
  0x1e   : > { %1768 = shalt.err (!%p1765_p8)
}
  0x1f   : > { %s1867_s21 = smov 64   ;;  %s1868_s22 = smov 4  }
  0x20   : > { %1583 = dma.hbm_to_vmem [thread:$0]  (!%p1981_p12), %s2611_s4, 1024, %s228_s16, [#allocation4], %s1867_s21, %s1867_s21, %s1868_s22  }
  0x21   : > { %s1780_s25 = scalar_lea.vmem %s241_s19, 1024  ;;  %p1788_p9 = scmp.lt.s32.totalorder %s241_s19, %s241_s19 }
  0x22   : > { %p1781_p11 = scmp.ne.s32.totalorder %s241_s19, %s1780_s25  ;;  %p1789_p6 = scmp.lt.s32.totalorder %s1780_s25, %s1780_s25 }
  0x24   : > { %p1783_p0 = pnand %p1781_p11, %p1745_p13  ;;  %p1790_p3 = por %p1789_p6, %p1788_p9 }
  0x26   : > { %p1784_p1 = pneg %p1783_p0 }
  0x28   : > { %p1791_p2 = pnand %p1790_p3, %p1784_p1 }
  0x2a   : > { %1794 = shalt.err (!%p1791_p2)
}
  0x2b   : > { %1586 = dma.hbm_to_vmem [thread:$0]  (!%p1981_p12), %s2612_s5, 1024, %s241_s19, [#allocation7], %s1867_s21, %s1867_s21, %s1868_s22  }
  0x2c   : > { %268 = sbr.rel (%p1973_p10) target bundleno = 974 (0x3ce), region = 48  ;;  %p2620_p4 = scmp.eq.s32.totalorder (!%p1973_p10), %s1945_s3, 0 }
  0x31   : > { %1838 = dma.done.wait (%p2620_p4), [#allocation4], 1024   ;;  %p2621_p13 = pmov %p2620_p4 }
  0x32   : > { %p2622_p7 = pmov %p2620_p4 }
  0x33   : > { %1840 = vsyncadd (%p2621_p13), [#allocation4], 4294966272 }
  0x34   : > { %1842 = dma.done.wait (%p2622_p7), [#allocation7], 1024   ;;  %p2623_p6 = pmov %p2620_p4 }
  0x35   : > { %s1456_s10 = sshll.u32 %s1945_s3, 3  ;;  %v1869_v0 = vmov 5   ;;  %v1870_v1 = vmov 2   ;;  %v1871_v5 = vmov 0   ;;  %v1872_v6 = vmov 1   ;;  %v737_v13 = vld [vmem:[%s2608_s1 + $0xf8] sm:$0xff] }
  0x36   : > { %1844 = vsyncadd (%p2623_p6), [#allocation7], 4294966272  ;;  %1650 = vset.pattern.permute.xlu0 %v1869_v0  ;;  %1643 = vset.pattern.permute.xlu1 %v1870_v1  ;;  %p305_p9 = scmp.lt.s32.totalorder %s1456_s10, 31  ;;  %v1873_v8 = vmov 7   ;;  %v1874_v9 = vmov 4   ;;  %v1875_v10 = vmov 6  }
  0x37   : > { %v1876_v12 = vmov 3   ;;  %738 = vmatprep.subr.mxu0 %v737_v13  ;;  %v736_v14 = vld [vmem:[%s2608_s1 + $0xf0] sm:$0xff]  ;;  %v735_v15 = vld [vmem:[%s2608_s1 + $0xe8] sm:$0xff]  ;;  %v734_v16 = vld [vmem:[%s2608_s1 + $0xe0] sm:$0xff]  ;;  %v1877_v45 = vmov 0.0   ;;  %s882_s9 = sld [smem:[#allocation2]] }
  0x38   : > { %s2630_s10 = smov (!%p305_p9, %s1456_s10), 31  ;;  %739 = vmatpush1.msra.mxu0 %v736_v14  ;;  %v733_v17 = vld [vmem:[%s2608_s1 + $0xd8] sm:$0xff]  ;;  %v732_v18 = vld [vmem:[%s2608_s1 + $0xd0] sm:$0xff]  ;;  %v731_v19 = vld [vmem:[%s2608_s1 + $0xc8] sm:$0xff]  ;;  %802 = vmatprep.mubr.f32.mxu0 %v1877_v45  ;;  %s1481_s19 = sshll.u32 %s1945_s3, 10 }
  0x39   : > { %s1457_s14 = sshll.u32 %s2630_s10, 3  ;;  %740 = vmatprep.subr.mxu0 %v735_v15  ;;  %v730_v20 = vld [vmem:[%s2608_s1 + $0xc0] sm:$0xff]  ;;  %v729_v21 = vld [vmem:[%s2608_s1 + $0xb8] sm:$0xff]  ;;  %v728_v22 = vld [vmem:[%s2608_s1 + $0xb0] sm:$0xff]  ;;  %s301_s10 = sand.u32 1, %s1855_s27  }
  0x3a   : > { %s2019_s17 = scalar_lea.vmem %s2607_s0, %s1457_s14  ;;  %741 = vmatpush1.msra.mxu0 %v734_v16  ;;  %v727_v24 = vld [vmem:[%s2608_s1 + $0xa8] sm:$0xff]  ;;  %v726_v25 = vld [vmem:[%s2608_s1 + $0xa0] sm:$0xff]  ;;  %v725_v26 = vld [vmem:[%s2608_s1 + $0x98] sm:$0xff]  ;;  %s1455_s14 = sshll.u32 %s301_s10, 6 }
  0x3b   : > { %v2022_v2 = vld [vmem:[%s2019_s17] sm:$0xff]  ;;  %v2027_v3 = vld [vmem:[%s2019_s17 + $0x10] sm:$0xff]  ;;  %v2030_v4 = vld [vmem:[%s2019_s17 + $0x8] sm:$0xff]  ;;  %742 = vmatprep.subr.mxu0 %v733_v17  ;;  %s2562_s22 = scalar_lea.hbm %s2614_s7, %s1481_s19  ;;  %s2567_s23 = scalar_lea.sflag [#allocation5], %s301_s10 }
  0x3c   : > { %555 = vperm.xlu0 %1650, %v2022_v2   ;;  %411 = vperm.xlu1 %1643, %v2022_v2   ;;  %v2037_v7 = vld [vmem:[%s2019_s17 + $0x28] sm:$0xff]  ;;  %v2053_v11 = vld [vmem:[%s2019_s17 + $0x18] sm:$0xff]  ;;  %v2102_v23 = vld [vmem:[%s2019_s17 + $0x30] sm:$0xff]  ;;  %s1878_s24 = smov [#allocation8]  }
  0x3d   : > { %743 = vmatpush1.msra.mxu0 %v732_v18  ;;  %v724_v27 = vld [vmem:[%s2608_s1 + $0x90] sm:$0xff]  ;;  %v723_v28 = vld [vmem:[%s2608_s1 + $0x88] sm:$0xff]  ;;  %v722_v29 = vld [vmem:[%s2608_s1 + $0x80] sm:$0xff]  ;;  %s1799_s25 = sshll.u32 %s1878_s24, 4  ;;  %s1800_s25 = int_to_ptr.vmem [resolvable:$false] %s1799_s25 }
  0x3e   : > { %744 = vmatprep.subr.mxu0 %v731_v19  ;;  %v721_v30 = vld [vmem:[%s2608_s1 + $0x78] sm:$0xff]  ;;  %v720_v31 = vld [vmem:[%s2608_s1 + $0x70] sm:$0xff]  ;;  %v719_v32 = vld [vmem:[%s2608_s1 + $0x68] sm:$0xff]  ;;  %s1801_s30 = scalar_lea.vmem %s1800_s25, 2048 }
  0x3f   : > { %745 = vmatpush1.msra.mxu0 %v730_v20  ;;  %v718_v33 = vld [vmem:[%s2608_s1 + $0x60] sm:$0xff]  ;;  %v717_v34 = vld [vmem:[%s2608_s1 + $0x58] sm:$0xff]  ;;  %v716_v36 = vld [vmem:[%s2608_s1 + $0x50] sm:$0xff] }
  0x40   : > { %561 = vperm.xlu0 %1650, %v2027_v3   ;;  %1644 = vset.pattern.permute.xlu1 %v1871_v5  ;;  %v2147_v35 = vld [vmem:[%s2019_s17 + $0x20] sm:$0xff]  ;;  %v715_v37 = vld [vmem:[%s2608_s1 + $0x48] sm:$0xff]  ;;  %v713_v39 = vld [vmem:[%s2608_s1 + $0x38] sm:$0xff] }
  0x41   : > { %326 = vperm.xlu1 %1644, %v2030_v4   ;;  %746 = vmatprep.subr.mxu0 %v729_v21  ;;  %v714_v38 = vld [vmem:[%s2608_s1 + $0x40] sm:$0xff]  ;;  %v2164_v40 = vld [vmem:[%s2019_s17 + $0x38] sm:$0xff]  ;;  %v712_v41 = vld [vmem:[%s2608_s1 + $0x30] sm:$0xff]  ;;  %s2546_s17 = scalar_lea.vmem [#allocation8], %s1455_s14 }
  0x42   : > { %747 = vmatpush1.msra.mxu0 %v728_v22  ;;  %v711_v42 = vld [vmem:[%s2608_s1 + $0x28] sm:$0xff]  ;;  %v710_v43 = vld [vmem:[%s2608_s1 + $0x20] sm:$0xff]  ;;  %v709_v44 = vld [vmem:[%s2608_s1 + $0x18] sm:$0xff]  ;;  %s1363_s18 = sshll.u32 %s2546_s17, 4  ;;  %s2556_s18 = int_to_ptr.vmem [resolvable:$true] %s1363_s18 }
  0x43   : > { %748 = vmatprep.subr.mxu0 %v727_v24  ;;  %v708_v46 = vld [vmem:[%s2608_s1 + $0x10] sm:$0xff]  ;;  %v707_v47 = vld [vmem:[%s2608_s1 + $0x8] sm:$0xff]  ;;  %v706_v48 = vld [vmem:[%s2608_s1] sm:$0xff]  ;;  %s1795_s3 = scalar_lea.vmem %s2556_s18, 1024  ;;  %p1802_p11 = scmp.lt.s32.totalorder %s2556_s18, %s1800_s25 }
  0x44   : > { %1661 = vset.pattern.permute.xlu0 %v1872_v6  ;;  %749 = vmatpush1.msra.mxu0 %v726_v25  ;;  %p1796_p10 = scmp.ne.s32.totalorder %s2556_s18, %s1795_s3  ;;  %p1803_p0 = scmp.lt.s32.totalorder %s1801_s30, %s1795_s3 }
  0x45   : > { %363 = vperm.xlu0 %1661, %v2022_v2   ;;  %1645 = vset.pattern.permute.xlu1 %v1872_v6 }
  0x46   : > { %366 = vperm.xlu1 %1645, %v2030_v4   ;;  %750 = vmatprep.subr.mxu0 %v725_v26  ;;  %p1797_p12 = pnand %p1796_p10, %p1962_p5  ;;  %p1804_p1 = por %p1803_p0, %p1802_p11 }
  0x47   : > { %751 = vmatpush1.msra.mxu0 %v724_v27 }
  0x48   : > { %752 = vmatprep.subr.mxu0 %v723_v28  ;;  %p1798_p8 = pneg %p1797_p12 }
  0x49   : > { %378 = vperm.xlu0 %1661, %v2037_v7   ;;  %753 = vmatpush1.msra.mxu0 %v722_v29 }
  0x4a   : > { %1646 = vset.pattern.permute.xlu1 %v1870_v1  ;;  %754 = vmatprep.subr.mxu0 %v721_v30  ;;  %p1805_p3 = pnand %p1804_p1, %p1798_p8 }
  0x4b   : > { %414 = vperm.xlu1 %1646, %v2030_v4   ;;  %755 = vmatpush1.msra.mxu0 %v720_v31 }
  0x4c   : > { %756 = vmatprep.subr.mxu0 %v719_v32 }
  0x4d   : > { %1668 = vset.pattern.permute.xlu0 %v1873_v8  ;;  %757 = vmatpush1.msra.mxu0 %v718_v33 }
  0x4e   : > { %657 = vperm.xlu0 %1668, %v2027_v3   ;;  %758 = vmatprep.subr.mxu0 %v717_v34 }
  0x4f   : > { %1647 = vset.pattern.permute.xlu1 %v1874_v9  ;;  %759 = vmatpush1.msra.mxu0 %v716_v36 }
  0x50   : > { %507 = vperm.xlu1 %1647, %v2022_v2   ;;  %760 = vmatprep.subr.mxu0 %v715_v37 }
  0x51   : > { %761 = vmatpush1.msra.mxu0 %v714_v38 }
  0x52   : > { %1669 = vset.pattern.permute.xlu0 %v1875_v10  ;;  %762 = vmatprep.subr.mxu0 %v713_v39 }
  0x53   : > { %603 = vperm.xlu0 %1669, %v2022_v2   ;;  %763 = vmatpush1.msra.mxu0 %v712_v41  ;;  %v2320_v41 = vld [vmem:[%s2609_s2] ss:$0 sm:$0xff] }
  0x54   : > { %1648 = vset.pattern.permute.xlu1 %v1872_v6  ;;  %764 = vmatprep.subr.mxu0 %v711_v42 }
  0x55   : > { %369 = vperm.xlu1 %1648, %v2027_v3   ;;  %765 = vmatpush1.msra.mxu0 %v710_v43 }
  0x56   : > { %766 = vmatprep.subr.mxu0 %v709_v44 }
  0x57   : > { %612 = vperm.xlu0 %1669, %v2053_v11   ;;  %767 = vmatpush1.msra.mxu0 %v708_v46 }
  0x58   : > { %768 = vmatprep.subr.mxu0 %v707_v47 }
  0x59   : > { %1649 = vset.pattern.permute.xlu1 %v1876_v12  ;;  %769 = vmatpush1.msra.mxu0 %v706_v48 }
  0x5a   : > { %462 = vperm.xlu1 %1649, %v2030_v4  }
  0x5b   : > { %1672 = vset.pattern.permute.xlu0 %v1876_v12 }
  0x5c   : > { %459 = vperm.xlu0 %1672, %v2022_v2  }
  0x5e   : > { %1651 = vset.pattern.permute.xlu1 %v1870_v1 }
  0x5f   : > { %417 = vperm.xlu1 %1651, %v2027_v3  }
  0x60   : > { %465 = vperm.xlu0 %1672, %v2027_v3  }
  0x63   : > { %1652 = vset.pattern.permute.xlu1 %v1874_v9 }
  0x64   : > { %474 = vperm.xlu0 %1672, %v2037_v7   ;;  %510 = vperm.xlu1 %1652, %v2030_v4  }
  0x68   : > { %1675 = vset.pattern.permute.xlu0 %v1870_v1  ;;  %1653 = vset.pattern.permute.xlu1 %v1871_v5 }
  0x69   : > { %420 = vperm.xlu0 %1675, %v2053_v11   ;;  %332 = vperm.xlu1 %1653, %v2053_v11  }
  0x6d   : > { %429 = vperm.xlu0 %1675, %v2102_v23   ;;  %1654 = vset.pattern.permute.xlu1 %v1872_v6 }
  0x6e   : > { %372 = vperm.xlu1 %1654, %v2053_v11  }
  0x71   : > { %1678 = vset.pattern.permute.xlu0 %v1871_v5 }
  0x72   : > { %323 = vperm.xlu0 %1678, %v2022_v2   ;;  %1655 = vset.pattern.permute.xlu1 %v1869_v0 }
  0x73   : > { %558 = vperm.xlu1 %1655, %v2030_v4  }
  0x76   : > { %329 = vperm.xlu0 %1678, %v2027_v3  }
  0x77   : > { %1656 = vset.pattern.permute.xlu1 %v1873_v8 }
  0x78   : > { %651 = vperm.xlu1 %1656, %v2022_v2  }
  0x7a   : > { %335 = vperm.xlu0 %1678, %v2147_v35  }
  0x7c   : > { %1657 = vset.pattern.permute.xlu1 %v1874_v9 }
  0x7d   : > { %513 = vperm.xlu1 %1657, %v2027_v3  }
  0x7e   : > { %344 = vperm.xlu0 %1678, %v2164_v40  }
  0x81   : > { %1658 = vset.pattern.permute.xlu1 %v1875_v10 }
  0x82   : > { %606 = vperm.xlu1 %1658, %v2030_v4   ;;  %1681 = vset.pattern.permute.xlu0 %v1874_v9 }
  0x83   : > { %516 = vperm.xlu0 %1681, %v2053_v11  }
  0x86   : > { %1659 = vset.pattern.permute.xlu1 %v1872_v6 }
  0x87   : > { %375 = vperm.xlu1 %1659, %v2147_v35   ;;  %525 = vperm.xlu0 %1681, %v2102_v23  }
  0x8b   : > { %1660 = vset.pattern.permute.xlu1 %v1876_v12  ;;  %1686 = vset.pattern.permute.xlu0 %v1869_v0 }
  0x8c   : > { %468 = vperm.xlu1 %1660, %v2053_v11   ;;  %570 = vperm.xlu0 %1686, %v2037_v7  }
  0x90   : > { %1662 = vset.pattern.permute.xlu1 %v1873_v8  ;;  %573 = vperm.xlu0 %1686, %v2102_v23  }
  0x91   : > { %654 = vperm.xlu1 %1662, %v2030_v4  }
  0x94   : > { %1691 = vset.pattern.permute.xlu0 %v1875_v10 }
  0x95   : > { %1663 = vset.pattern.permute.xlu1 %v1870_v1  ;;  %621 = vperm.xlu0 %1691, %v2102_v23  }
  0x96   : > { %423 = vperm.xlu1 %1663, %v2147_v35  }
  0x99   : > { %624 = vperm.xlu0 %1691, %v2164_v40  }
  0x9a   : > { %1664 = vset.pattern.permute.xlu1 %v1875_v10 }
  0x9b   : > { %609 = vperm.xlu1 %1664, %v2027_v3  }
  0x9d   : > { %1694 = vset.pattern.permute.xlu0 %v1873_v8 }
  0x9f   : > { %1665 = vset.pattern.permute.xlu1 %v1871_v5 }
  0xa0   : > { %338 = vperm.xlu1 %1665, %v2037_v7  }
  0xa4   : > { %1666 = vset.pattern.permute.xlu1 %v1876_v12 }
  0xa5   : > { %471 = vperm.xlu1 %1666, %v2147_v35  }
  0xa9   : > { %1667 = vset.pattern.permute.xlu1 %v1869_v0 }
  0xaa   : > { %564 = vperm.xlu1 %1667, %v2053_v11  }
  0xae   : > { %1670 = vset.pattern.permute.xlu1 %v1870_v1 }
  0xaf   : > { %426 = vperm.xlu1 %1670, %v2037_v7  }
  0xb3   : > { %1671 = vset.pattern.permute.xlu1 %v1874_v9 }
  0xb4   : > { %519 = vperm.xlu1 %1671, %v2147_v35  }
  0xb7   : > { %v2223_v49 = vpop.permute.xlu1 %411  ;;  %v2225_v50 = vpop.permute.xlu0 %555 }
  0xb8   : > { %1673 = vset.pattern.permute.xlu1 %v1871_v5 }
  0xb9   : > { %341 = vperm.xlu1 %1673, %v2102_v23  }
  0xbb   : > { %v2229_v51 = vpop.permute.xlu0 %561 }
  0xbc   : > { %v2231_v52 = vpop.permute.xlu1 %326 }
  0xbd   : > { %1674 = vset.pattern.permute.xlu1 %v1872_v6 }
  0xbe   : > { %381 = vperm.xlu1 %1674, %v2102_v23  }
  0xc0   : > { %v364_v53 = vpop.permute.xlu0 %363 }
  0xc1   : > { %v2235_v54 = vpop.permute.xlu1 %366 }
  0xc2   : > { %1676 = vset.pattern.permute.xlu1 %v1869_v0 }
  0xc3   : > { %567 = vperm.xlu1 %1676, %v2147_v35  }
  0xc4   : > { %v2239_v55 = vpop.permute.xlu0 %378 }
  0xc6   : > { %v2241_v56 = vpop.permute.xlu1 %414 }
  0xc7   : > { %1677 = vset.pattern.permute.xlu1 %v1873_v8 }
  0xc8   : > { %660 = vperm.xlu1 %1677, %v2053_v11  }
  0xc9   : > { %v2245_v57 = vpop.permute.xlu0 %657 }
  0xcb   : > { %v508_v58 = vpop.permute.xlu1 %507 }
  0xcc   : > { %1679 = vset.pattern.permute.xlu1 %v1874_v9 }
  0xcd   : > { %522 = vperm.xlu1 %1679, %v2037_v7  }
  0xce   : > { %v604_v59 = vpop.permute.xlu0 %603 }
  0xd0   : > { %v2249_v60 = vpop.permute.xlu1 %369 }
  0xd1   : > { %1680 = vset.pattern.permute.xlu1 %v1875_v10 }
  0xd2   : > { %615 = vperm.xlu1 %1680, %v2147_v35   ;;  %v2253_v61 = vpop.permute.xlu0 %612 }
  0xd5   : > { %v2255_v62 = vpop.permute.xlu1 %462 }
  0xd6   : > { %1682 = vset.pattern.permute.xlu1 %v1872_v6  ;;  %v320_v6 = vlaneseq }
  0xd7   : > { %384 = vperm.xlu1 %1682, %v2164_v40   ;;  %v460_v63 = vpop.permute.xlu0 %459 }
  0xd8   : > { %v2272_v15 = vand.u32 127, %v320_v6 }
  0xda   : > { %v2259_v2 = vpop.permute.xlu1 %417  ;;  %vm386_vm2 = vcmp.eq.s32.totalorder %v364_v53, %v2272_v15  ;;  %vm434_vm4 = vcmp.eq.s32.totalorder %v2223_v49, %v2272_v15  ;;  %vm482_vm5 = vcmp.eq.s32.totalorder %v460_v63, %v2272_v15  ;;  %vm578_vm7 = vcmp.eq.s32.totalorder %v2225_v50, %v2272_v15 }
  0xdb   : > { %1683 = vset.pattern.permute.xlu1 %v1876_v12  ;;  %v2262_v3 = vpop.permute.xlu0 %465  ;;  %v394_v21 = vsel %vm386_vm2, 1, %v1871_v5  ;;  %v442_v27 = vsel %vm434_vm4, 1, %v1871_v5  ;;  %v490_v28 = vsel %vm482_vm5, 1, %v1871_v5  ;;  %vm530_vm8 = vcmp.eq.s32.totalorder %v508_v58, %v2272_v15 }
  0xdc   : > { %477 = vperm.xlu1 %1683, %v2102_v23   ;;  %vm626_vm9 = vcmp.eq.s32.totalorder %v604_v59, %v2272_v15  ;;  %v538_v32 = vsel %vm530_vm8, 1, %v1871_v5  ;;  %vm387_vm11 = vcmp.eq.s32.totalorder %v2235_v54, %v2272_v15  ;;  %vm347_vm12 = vcmp.eq.s32.totalorder %v2231_v52, %v2272_v15 }
  0xdd   : > { %v634_v34 = vsel %vm626_vm9, 1, %v1871_v5  ;;  %vm435_vm13 = vcmp.eq.s32.totalorder %v2241_v56, %v2272_v15  ;;  %vm483_vm14 = vcmp.eq.s32.totalorder %v2255_v62, %v2272_v15  ;;  %vm484_vm5 = vcmp.eq.s32.totalorder %v2262_v3, %v2272_v15 }
  0xde   : > { %v443_v46 = vsel %vm435_vm13, 1, %v1871_v5  ;;  %v491_v49 = vsel %vm483_vm14, 1, %v1871_v5  ;;  %vm391_vm14 = vcmp.eq.s32.totalorder %v2239_v55, %v2272_v15 }
  0xdf   : > { %v2265_v4 = vpop.permute.xlu1 %510  ;;  %v2267_v11 = vpop.permute.xlu0 %474 }
  0xe0   : > { %1684 = vset.pattern.permute.xlu1 %v1873_v8 }
  0xe1   : > { %663 = vperm.xlu1 %1684, %v2147_v35  }
  0xe4   : > { %v333_v13 = vpop.permute.xlu1 %332  ;;  %v421_v14 = vpop.permute.xlu0 %420 }
  0xe5   : > { %1685 = vset.pattern.permute.xlu1 %v1870_v1  ;;  %vm349_vm0 = vcmp.eq.s32.totalorder %v333_v13, %v2272_v15  ;;  %vm437_vm1 = vcmp.eq.s32.totalorder %v421_v14, %v2272_v15 }
  0xe6   : > { %432 = vperm.xlu1 %1685, %v2164_v40   ;;  %v357_v18 = vsel %vm349_vm0, 1, %v1871_v5  ;;  %v445_v1 = vsel %vm437_vm1, 1, %v1871_v5  ;;  %vm388_vm0 = vcmp.eq.s32.totalorder %v2249_v60, %v2272_v15  ;;  %vm531_vm1 = vcmp.eq.s32.totalorder %v2265_v4, %v2272_v15 }
  0xe7   : > { %v396_v53 = vsel %vm388_vm0, 1, %v1871_v5  ;;  %v539_v54 = vsel %vm531_vm1, 1, %v1871_v5 }
  0xe8   : > { %v2277_v16 = vpop.permute.xlu0 %429 }
  0xe9   : > { %v373_v17 = vpop.permute.xlu1 %372 }
  0xea   : > { %vm389_vm3 = vcmp.eq.s32.totalorder %v373_v17, %v2272_v15  ;;  %1687 = vset.pattern.permute.xlu1 %v1875_v10 }
  0xeb   : > { %v397_v19 = vsel %vm389_vm3, 1, %v1871_v5  ;;  %618 = vperm.xlu1 %1687, %v2037_v7   ;;  %vm436_vm3 = vcmp.eq.s32.totalorder %v2259_v2, %v2272_v15  ;;  %v492_v2 = vsel %vm484_vm5, 1, %v1871_v5 }
  0xec   : > { %v405_v20 = vadd.s32 %v397_v19, %v357_v18  ;;  %v444_v62 = vsel %vm436_vm3, 1, %v1871_v5 }
  0xed   : > { %v324_v22 = vpop.permute.xlu0 %323 }
  0xee   : > { %vm346_vm6 = vcmp.eq.s32.totalorder %v324_v22, %v2272_v15  ;;  %v2291_v10 = vpop.permute.xlu1 %558  ;;  %v2293_v24 = vadd.s32 %v445_v1, %v405_v20 }
  0xef   : > { %v354_v25 = vsel %vm346_vm6, 1, %v1871_v5  ;;  %1688 = vset.pattern.permute.xlu1 %v1876_v12  ;;  %v586_v12 = vsel %vm578_vm7, 1, %v1871_v5  ;;  %vm579_vm2 = vcmp.eq.s32.totalorder %v2291_v10, %v2272_v15 }
  0xf0   : > { %v402_v26 = vadd.s32 %v394_v21, %v354_v25  ;;  %480 = vperm.xlu1 %1688, %v2164_v40   ;;  %v587_v59 = vsel %vm579_vm2, 1, %v1871_v5  ;;  %vm629_vm2 = vcmp.eq.s32.totalorder %v2253_v61, %v2272_v15 }
  0xf1   : > { %v330_v42 = vpop.permute.xlu0 %329 }
  0xf2   : > { %v450_v29 = vadd.s32 %v442_v27, %v402_v26  ;;  %vm348_vm15 = vcmp.eq.s32.totalorder %v330_v42, %v2272_v15 }
  0xf3   : > { %v652_v30 = vpop.permute.xlu1 %651  ;;  %v356_v50 = vsel %vm348_vm15, 1, %v1871_v5 }
  0xf4   : > { %v498_v31 = vadd.s32 %v490_v28, %v450_v29  ;;  %1689 = vset.pattern.permute.xlu1 %v1873_v8  ;;  %vm674_vm10 = vcmp.eq.s32.totalorder %v652_v30, %v2272_v15  ;;  %v404_v58 = vadd.s32 %v396_v53, %v356_v50 }
  0xf5   : > { %666 = vperm.xlu1 %1689, %v2037_v7   ;;  %v682_v38 = vsel %vm674_vm10, 1, %v1871_v5  ;;  %v336_v60 = vpop.permute.xlu0 %335  ;;  %vm580_vm10 = vcmp.eq.s32.totalorder %v2229_v51, %v2272_v15 }
  0xf6   : > { %v546_v33 = vadd.s32 %v538_v32, %v498_v31  ;;  %v452_v6 = vadd.s32 %v444_v62, %v404_v58  ;;  %vm350_vm6 = vcmp.eq.s32.totalorder %v336_v60, %v2272_v15  ;;  %v588_v26 = vsel %vm580_vm10, 1, %v1871_v5 }
  0xf7   : > { %v358_v17 = vsel %vm350_vm6, 1, %v1871_v5  ;;  %v399_v32 = vsel %vm391_vm14, 1, %v1871_v5 }
  0xf8   : > { %v594_v35 = vadd.s32 %v586_v12, %v546_v33  ;;  %v2310_v36 = vpop.permute.xlu1 %513  ;;  %v500_v14 = vadd.s32 %v492_v2, %v452_v6 }
  0xf9   : > { %1690 = vset.pattern.permute.xlu1 %v1874_v9  ;;  %v395_v9 = vsel %vm387_vm11, 1, %v1871_v5  ;;  %vm532_vm8 = vcmp.eq.s32.totalorder %v2310_v36, %v2272_v15  ;;  %v2377_v51 = vpop.permute.xlu0 %344 }
  0xfa   : > { %v642_v37 = vadd.s32 %v634_v34, %v594_v35  ;;  %528 = vperm.xlu1 %1690, %v2164_v40   ;;  %v540_v19 = vsel %vm532_vm8, 1, %v1871_v5 }
  0xfb   : > { %v548_v10 = vadd.s32 %v540_v19, %v500_v14 }
  0xfc   : > { %v690_v39 = vadd.s32 %v682_v38, %v642_v37 }
  0xfd   : > { %v607_v7 = vpop.permute.xlu1 %606  ;;  %v596_v29 = vadd.s32 %v588_v26, %v548_v10 }
  0xfe   : > { %v698_v43 = vcvt.s32.f32 %v690_v39  ;;  %1692 = vset.pattern.permute.xlu1 %v1869_v0  ;;  %v355_v0 = vsel %vm347_vm12, 1, %v1871_v5  ;;  %vm627_vm4 = vcmp.eq.s32.totalorder %v607_v7, %v2272_v15  ;;  %vm676_vm12 = vcmp.eq.s32.totalorder %v2245_v57, %v2272_v15  ;;  %v517_v57 = vpop.permute.xlu0 %516 }
  0xff   : > { %576 = vperm.xlu1 %1692, %v2164_v40   ;;  %v403_v48 = vadd.s32 %v395_v9, %v355_v0  ;;  %v635_v63 = vsel %vm627_vm4, 1, %v1871_v5  ;;  %v684_v30 = vsel %vm676_vm12, 1, %v1871_v5  ;;  %vm533_vm1 = vcmp.eq.s32.totalorder %v517_v57, %v2272_v15 }
 0x100   : > { %803 = vmatmul.mubr.f32.vlgmr.msra.gmra.mxu0 %v698_v43  ;;  %v858_v44 = vmul.f32 %v2320_v41, %v698_v43  ;;  %v541_v7 = vsel %vm533_vm1, 1, %v1871_v5  ;;  %v637_v9 = vsel %vm629_vm2, 1, %v1871_v5  ;;  %vm487_vm4 = vcmp.eq.s32.totalorder %v2267_v11, %v2272_v15 }
 0x101   : > { %808 = vmatprep.mubr.f32.mxu0 %v1877_v45  ;;  %v451_v52 = vadd.s32 %v443_v46, %v403_v48  ;;  %v495_v61 = vsel %vm487_vm4, 1, %v1871_v5  ;;  %vm440_vm1 = vcmp.eq.s32.totalorder %v2277_v16, %v2272_v15 }
 0x102   : > { %866 = vadd.xlane.f32.xlu0 %v858_v44  ;;  %v376_v47 = vpop.permute.xlu1 %375 }
 0x103   : > { %1693 = vset.pattern.permute.xlu1 %v1873_v8  ;;  %v499_v56 = vadd.s32 %v491_v49, %v451_v52  ;;  %vm390_vm7 = vcmp.eq.s32.totalorder %v376_v47, %v2272_v15 }
 0x104   : > { %669 = vperm.xlu1 %1693, %v2102_v23   ;;  %v398_v18 = vsel %vm390_vm7, 1, %v1871_v5 }
 0x105   : > { %v547_v23 = vadd.s32 %v539_v54, %v499_v56  ;;  %v406_v22 = vadd.s32 %v398_v18, %v358_v17 }
 0x107   : > { %v469_v8 = vpop.permute.xlu1 %468  ;;  %v595_v4 = vadd.s32 %v587_v59, %v547_v23 }
 0x108   : > { %672 = vperm.xlu1 %1693, %v2164_v40   ;;  %vm485_vm15 = vcmp.eq.s32.totalorder %v469_v8, %v2272_v15 }
 0x109   : > { %v643_v40 = vadd.s32 %v635_v63, %v595_v4  ;;  %v493_v55 = vsel %vm485_vm15, 1, %v1871_v5 }
 0x10a   : > { %v501_v39 = vadd.s32 %v493_v55, %v2293_v24  ;;  %v1697_v55 = vld [vmem:[#allocation6 + $0x28] sm:$0xff]  }
 0x10c   : > { %v655_v13 = vpop.permute.xlu1 %654  ;;  %v549_v43 = vadd.s32 %v541_v7, %v501_v39 }
 0x10d   : > { %vm675_vm9 = vcmp.eq.s32.totalorder %v655_v13, %v2272_v15 }
 0x10e   : > { %v683_v3 = vsel %vm675_vm9, 1, %v1871_v5 }
 0x10f   : > { %v691_v1 = vadd.s32 %v683_v3, %v643_v40 }
 0x111   : > { %v699_v20 = vcvt.s32.f32 %v691_v1  ;;  %v424_v21 = vpop.permute.xlu1 %423 }
 0x112   : > { %vm438_vm11 = vcmp.eq.s32.totalorder %v424_v21, %v2272_v15  ;;  %v526_v21 = vpop.permute.xlu0 %525 }
 0x113   : > { %v446_v25 = vsel %vm438_vm11, 1, %v1871_v5  ;;  %809 = vmatmul.mubr.f32.gmra.mxu0 %v699_v20  ;;  %v859_v24 = vmul.f32 %v2320_v41, %v699_v20 }
 0x114   : > { %v2372_v27 = vadd.s32 %v446_v25, %v406_v22  ;;  %814 = vmatprep.mubr.f32.mxu0 %v1877_v45 }
 0x116   : > { %v610_v28 = vpop.permute.xlu1 %609  ;;  %v571_v26 = vpop.permute.xlu0 %570 }
 0x117   : > { %vm628_vm13 = vcmp.eq.s32.totalorder %v610_v28, %v2272_v15  ;;  %v1695_v28 = vld [vmem:[#allocation6 + $0x38] sm:$0xff]   ;;  %vm583_vm14 = vcmp.eq.s32.totalorder %v571_v26, %v2272_v15 }
 0x118   : > { %v636_v31 = vsel %vm628_vm13, 1, %v1871_v5  ;;  %1506 = vmatprep.subr.bf16.mxu1 %v1695_v28 }
 0x119   : > { %v644_v12 = vadd.s32 %v636_v31, %v596_v29  ;;  %1507 = vmatpush3.bf16.msra.mxu1 %v1695_v28 }
 0x11a   : > { %v574_v39 = vpop.permute.xlu0 %573 }
 0x11b   : > { %v339_v33 = vpop.permute.xlu1 %338  ;;  %v692_v34 = vadd.s32 %v684_v30, %v644_v12 }
 0x11c   : > { %vm351_vm0 = vcmp.eq.s32.totalorder %v339_v33, %v2272_v15 }
 0x11d   : > { %v359_v35 = vsel %vm351_vm0, 1, %v1871_v5  ;;  %v700_v36 = vcvt.s32.f32 %v692_v34 }
 0x11e   : > { %v407_v37 = vadd.s32 %v399_v32, %v359_v35  ;;  %v591_v32 = vsel %vm583_vm14, 1, %v1871_v5  ;;  %v448_v35 = vsel %vm440_vm1, 1, %v1871_v5 }
 0x11f   : > { %815 = vmatmul.mubr.f32.gmra.mxu0 %v700_v36  ;;  %v860_v50 = vmul.f32 %v2320_v41, %v700_v36 }
 0x120   : > { %v472_v38 = vpop.permute.xlu1 %471  ;;  %820 = vmatprep.mubr.f32.mxu0 %v1877_v45 }
 0x121   : > { %vm486_vm7 = vcmp.eq.s32.totalorder %v472_v38, %v2272_v15 }
 0x122   : > { %v494_v4 = vsel %vm486_vm7, 1, %v1871_v5 }
 0x123   : > { %v502_v2 = vadd.s32 %v494_v4, %v2372_v27  ;;  %v1700_v4 = vld [vmem:[#allocation6 + $0x10] sm:$0xff]  }
 0x125   : > { %v565_v42 = vpop.permute.xlu1 %564 }
 0x126   : > { %vm581_vm3 = vcmp.eq.s32.totalorder %v565_v42, %v2272_v15 }
 0x127   : > { %v589_v44 = vsel %vm581_vm3, 1, %v1871_v5  ;;  %vm353_vm3 = vcmp.eq.s32.totalorder %v2377_v51, %v2272_v15  ;;  %v1699_v51 = vld [vmem:[#allocation6 + $0x18] sm:$0xff]  }
 0x128   : > { %v597_v0 = vadd.s32 %v589_v44, %v549_v43  ;;  %v1698_v44 = vld [vmem:[#allocation6 + $0x20] sm:$0xff]  }
 0x12a   : > { %v427_v46 = vpop.permute.xlu1 %426  ;;  %v645_v47 = vadd.s32 %v637_v9, %v597_v0 }
 0x12b   : > { %vm439_vm5 = vcmp.eq.s32.totalorder %v427_v46, %v2272_v15  ;;  %v361_v46 = vsel %vm353_vm3, 1, %v1871_v5 }
 0x12c   : > { %v447_v48 = vsel %vm439_vm5, 1, %v1871_v5  ;;  %868 = vadd.xlane.f32.xlu1 %v859_v24  ;;  %vm536_vm5 = vcmp.eq.s32.totalorder %v526_v21, %v2272_v15 }
 0x12d   : > { %v455_v49 = vadd.s32 %v447_v48, %v407_v37  ;;  %v1696_v37 = vld [vmem:[#allocation6 + $0x30] sm:$0xff]   ;;  %v544_v24 = vsel %vm536_vm5, 1, %v1871_v5 }
 0x12e   : > { %1508 = vmatprep.subr.bf16.mxu1 %v1696_v37 }
 0x12f   : > { %v520_v52 = vpop.permute.xlu1 %519  ;;  %v503_v53 = vadd.s32 %v495_v61, %v455_v49  ;;  %1509 = vmatpush3.bf16.msra.mxu1 %v1696_v37  ;;  %v622_v49 = vpop.permute.xlu0 %621 }
 0x130   : > { %870 = vadd.xlane.f32.xlu1 %v860_v50  ;;  %vm534_vm8 = vcmp.eq.s32.totalorder %v520_v52, %v2272_v15  ;;  %1510 = vmatprep.subr.bf16.mxu1 %v1697_v55 }
 0x131   : > { %v542_v6 = vsel %vm534_vm8, 1, %v1871_v5  ;;  %vm584_vm8 = vcmp.eq.s32.totalorder %v574_v39, %v2272_v15 }
 0x132   : > { %v550_v3 = vadd.s32 %v542_v6, %v502_v2 }
 0x133   : > { %1511 = vmatpush3.bf16.msra.mxu1 %v1697_v55 }
 0x134   : > { %v342_v54 = vpop.permute.xlu1 %341  ;;  %1512 = vmatprep.subr.bf16.mxu1 %v1698_v44 }
 0x135   : > { %vm352_vm15 = vcmp.eq.s32.totalorder %v342_v54, %v2272_v15 }
 0x136   : > { %v360_v33 = vsel %vm352_vm15, 1, %v1871_v5 }
 0x137   : > { %1513 = vmatpush3.bf16.msra.mxu1 %v1698_v44 }
 0x138   : > { %1514 = vmatprep.subr.bf16.mxu1 %v1699_v51 }
 0x139   : > { %v382_v56 = vpop.permute.xlu1 %381 }
 0x13a   : > { %vm392_vm13 = vcmp.eq.s32.totalorder %v382_v56, %v2272_v15  ;;  %v592_v56 = vsel %vm584_vm8, 1, %v1871_v5 }
 0x13b   : > { %v400_v30 = vsel %vm392_vm13, 1, %v1871_v5  ;;  %1515 = vmatpush3.bf16.msra.mxu1 %v1699_v51 }
 0x13c   : > { %v408_v34 = vadd.s32 %v400_v30, %v360_v33  ;;  %1516 = vmatprep.subr.bf16.mxu1 %v1700_v4  ;;  %v2482_v33 = vstv %s882_s9 }
 0x13e   : > { %v568_v11 = vpop.permute.xlu1 %567  ;;  %v456_v42 = vadd.s32 %v448_v35, %v408_v34 }
 0x13f   : > { %vm582_vm9 = vcmp.eq.s32.totalorder %v568_v11, %v2272_v15  ;;  %1517 = vmatpush3.bf16.msra.mxu1 %v1700_v4 }
 0x140   : > { %v590_v40 = vsel %vm582_vm9, 1, %v1871_v5 }
 0x141   : > { %v598_v17 = vadd.s32 %v590_v40, %v550_v3 }
 0x143   : > { %v661_v58 = vpop.permute.xlu1 %660 }
 0x144   : > { %vm677_vm6 = vcmp.eq.s32.totalorder %v661_v58, %v2272_v15 }
 0x145   : > { %v685_v8 = vsel %vm677_vm6, 1, %v1871_v5 }
 0x146   : > { %v2407_v59 = vadd.s32 %v685_v8, %v645_v47 }
 0x148   : > { %v701_v23 = vcvt.s32.f32 %v2407_v59  ;;  %v523_v60 = vpop.permute.xlu1 %522 }
 0x149   : > { %vm535_vm12 = vcmp.eq.s32.totalorder %v523_v60, %v2272_v15 }
 0x14a   : > { %821 = vmatmul.mubr.f32.gmra.mxu0 %v701_v23  ;;  %v543_v29 = vsel %vm535_vm12, 1, %v1871_v5 }
 0x14b   : > { %826 = vmatprep.mubr.f32.mxu0 %v1877_v45  ;;  %v551_v31 = vadd.s32 %v543_v29, %v503_v53 }
 0x14d   : > { %v616_v62 = vpop.permute.xlu1 %615  ;;  %v599_v36 = vadd.s32 %v591_v32, %v551_v31 }
 0x14e   : > { %vm630_vm10 = vcmp.eq.s32.totalorder %v616_v62, %v2272_v15  ;;  %v625_v62 = vpop.permute.xlu0 %624 }
 0x14f   : > { %v638_v14 = vsel %vm630_vm10, 1, %v1871_v5  ;;  %vm633_vm13 = vcmp.eq.s32.totalorder %v625_v62, %v2272_v15 }
 0x150   : > { %v646_v1 = vadd.s32 %v638_v14, %v598_v17  ;;  %v641_v59 = vsel %vm633_vm13, 1, %v1871_v5 }
 0x152   : > { %v2414_v63 = vpop.permute.xlu1 %384 }
 0x153   : > { %vm393_vm6 = vcmp.eq.s32.totalorder %v2414_v63, %v2272_v15  ;;  %v861_v63 = vmul.f32 %v2320_v41, %v701_v23 }
 0x154   : > { %v401_v47 = vsel %vm393_vm6, 1, %v1871_v5 }
 0x155   : > { %v409_v53 = vadd.s32 %v401_v47, %v361_v46 }
 0x157   : > { %v478_v13 = vpop.permute.xlu1 %477 }
 0x158   : > { %vm488_vm2 = vcmp.eq.s32.totalorder %v478_v13, %v2272_v15 }
 0x159   : > { %v496_v16 = vsel %vm488_vm2, 1, %v1871_v5 }
 0x15a   : > { %v504_v0 = vadd.s32 %v496_v16, %v456_v42 }
 0x15c   : > { %v664_v18 = vpop.permute.xlu1 %663  ;;  %v552_v54 = vadd.s32 %v544_v24, %v504_v0 }
 0x15d   : > { %vm678_vm11 = vcmp.eq.s32.totalorder %v664_v18, %v2272_v15 }
 0x15e   : > { %v686_v19 = vsel %vm678_vm11, 1, %v1871_v5  ;;  %vm632_vm11 = vcmp.eq.s32.totalorder %v622_v49, %v2272_v15  ;;  %v600_v6 = vadd.s32 %v592_v56, %v552_v54 }
 0x15f   : > { %v694_v20 = vadd.s32 %v686_v19, %v646_v1  ;;  %v640_v13 = vsel %vm632_vm11, 1, %v1871_v5 }
 0x160   : > { %v648_v17 = vadd.s32 %v640_v13, %v600_v6 }
 0x161   : > { %v702_v22 = vcvt.s32.f32 %v694_v20  ;;  %v433_v10 = vpop.permute.xlu1 %432  ;;  %v1701_v20 = vld [vmem:[#allocation6 + $0x8] sm:$0xff]  }
 0x162   : > { %vm441_vm7 = vcmp.eq.s32.totalorder %v433_v10, %v2272_v15  ;;  %1518 = vmatprep.subr.bf16.mxu1 %v1701_v20 }
 0x163   : > { %827 = vmatmul.mubr.f32.gmra.mxu0 %v702_v22  ;;  %v862_v25 = vmul.f32 %v2320_v41, %v702_v22  ;;  %v449_v50 = vsel %vm441_vm7, 1, %v1871_v5  ;;  %1519 = vmatpush3.bf16.msra.mxu1 %v1701_v20 }
 0x164   : > { %832 = vmatprep.mubr.f32.mxu0 %v1877_v45  ;;  %v457_v58 = vadd.s32 %v449_v50, %v409_v53 }
 0x165   : > { %874 = vadd.xlane.f32.xlu0 %v862_v25 }
 0x166   : > { %v619_v27 = vpop.permute.xlu1 %618 }
 0x167   : > { %vm631_vm0 = vcmp.eq.s32.totalorder %v619_v27, %v2272_v15  ;;  %v1702_v27 = vld [vmem:[#allocation6] sm:$0xff]  }
 0x168   : > { %v639_v57 = vsel %vm631_vm0, 1, %v1871_v5  ;;  %1520 = vmatprep.subr.bf16.mxu1 %v1702_v27 }
 0x169   : > { %v647_v7 = vadd.s32 %v639_v57, %v599_v36  ;;  %1521 = vmatpush3.bf16.msra.mxu1 %v1702_v27 }
 0x16b   : > { %v481_v12 = vpop.permute.xlu1 %480 }
 0x16c   : > { %vm489_vm9 = vcmp.eq.s32.totalorder %v481_v12, %v2272_v15 }
 0x16d   : > { %v497_v11 = vsel %vm489_vm9, 1, %v1871_v5 }
 0x16e   : > { %v505_v2 = vadd.s32 %v497_v11, %v457_v58 }
 0x170   : > { %v667_v38 = vpop.permute.xlu1 %666 }
 0x171   : > { %vm679_vm4 = vcmp.eq.s32.totalorder %v667_v38, %v2272_v15 }
 0x172   : > { %v687_v43 = vsel %vm679_vm4, 1, %v1871_v5 }
 0x173   : > { %v695_v9 = vadd.s32 %v687_v43, %v647_v7 }
 0x175   : > { %v703_v61 = vcvt.s32.f32 %v695_v9  ;;  %v529_v48 = vpop.permute.xlu1 %528 }
 0x176   : > { %vm537_vm10 = vcmp.eq.s32.totalorder %v529_v48, %v2272_v15 }
 0x177   : > { %833 = vmatmul.mubr.f32.gmra.mxu0 %v703_v61  ;;  %v863_v52 = vmul.f32 %v2320_v41, %v703_v61  ;;  %v545_v60 = vsel %vm537_vm10, 1, %v1871_v5 }
 0x178   : > { %838 = vmatprep.mubr.f32.mxu0 %v1877_v45  ;;  %v553_v3 = vadd.s32 %v545_v60, %v505_v2 }
 0x179   : > { %876 = vadd.xlane.f32.xlu0 %v863_v52 }
 0x17a   : > { %v577_v8 = vpop.permute.xlu1 %576 }
 0x17b   : > { %vm585_vm12 = vcmp.eq.s32.totalorder %v577_v8, %v2272_v15 }
 0x17c   : > { %v593_v40 = vsel %vm585_vm12, 1, %v1871_v5 }
 0x17d   : > { %872 = vadd.xlane.f32.xlu0 %v861_v63  ;;  %v601_v18 = vadd.s32 %v593_v40, %v553_v3  ;;  %v1703_v3 = vld [vmem:[#allocation3 + $0x38] sm:$0xff]  }
 0x17e   : > { %1530 = vmatprep.subr.bf16.mxu0 %v1703_v3  ;;  %1554 = vmatprep.subr.bf16.mxu1 %v1703_v3 }
 0x17f   : > { %v670_v14 = vpop.permute.xlu1 %669  ;;  %v649_v21 = vadd.s32 %v641_v59, %v601_v18  ;;  %1531 = vmatpush3.bf16.msra.mxu0 %v1703_v3  ;;  %v1704_v18 = vld [vmem:[#allocation3 + $0x30] sm:$0xff]  }
 0x180   : > { %vm680_vm14 = vcmp.eq.s32.totalorder %v670_v14, %v2272_v15  ;;  %1532 = vmatprep.subr.bf16.mxu0 %v1704_v18 }
 0x181   : > { %v688_v23 = vsel %vm680_vm14, 1, %v1871_v5 }
 0x182   : > { %v696_v1 = vadd.s32 %v688_v23, %v648_v17 }
 0x183   : > { %v673_v19 = vpop.permute.xlu1 %672  ;;  %1533 = vmatpush3.bf16.msra.mxu0 %v1704_v18 }
 0x184   : > { %v704_v22 = vcvt.s32.f32 %v696_v1  ;;  %vm681_vm15 = vcmp.eq.s32.totalorder %v673_v19, %v2272_v15  ;;  %v1705_v1 = vld [vmem:[#allocation3 + $0x28] sm:$0xff]  }
 0x185   : > { %v689_v10 = vsel %vm681_vm15, 1, %v1871_v5  ;;  %1534 = vmatprep.subr.bf16.mxu0 %v1705_v1 }
 0x186   : > { %v697_v25 = vadd.s32 %v689_v10, %v649_v21  ;;  %839 = vmatmul.mubr.f32.gmra.mxu0 %v704_v22  ;;  %v864_v26 = vmul.f32 %v2320_v41, %v704_v22 }
 0x187   : > { %844 = vmatprep.mubr.f32.mxu0 %v1877_v45  ;;  %1535 = vmatpush3.bf16.msra.mxu0 %v1705_v1 }
 0x188   : > { %v705_v28 = vcvt.s32.f32 %v697_v25  ;;  %878 = vadd.xlane.f32.xlu1 %v864_v26 }
 0x18a   : > { %845 = vmatmul.mubr.f32.gmra.mxu0 %v705_v28  ;;  %v865_v29 = vmul.f32 %v2320_v41, %v705_v28 }
 0x18b   : > { %v867_v34 = vpop.xlane.xlu0 %866 }
 0x18c   : > { %880 = vadd.xlane.f32.xlu0 %v865_v29  ;;  %v884_v41 = vadd.f32 %v2482_v33, %v867_v34  ;;  %v1706_v29 = vld [vmem:[#allocation3 + $0x20] sm:$0xff]  }
 0x18d   : > { %1536 = vmatprep.subr.bf16.mxu0 %v1706_v29 }
 0x18e   : > { %1537 = vmatpush3.bf16.msra.mxu0 %v1706_v29 }
 0x1b5   : > { %v869_v39 = vpop.xlane.xlu1 %868 }
 0x1b6   : > { %v885_v43 = vadd.f32 %v2482_v33, %v869_v39 }
 0x1b9   : > { %v871_v61 = vpop.xlane.xlu1 %870 }
 0x1ba   : > { %v886_v50 = vadd.f32 %v2482_v33, %v871_v61 }
 0x1c0   : > { %v804_v15 = vpop.f32.mrf.mxu0 }
 0x1c1   : > { %v892_v30 = vmul.f32 %v804_v15, %v804_v15 }
 0x1c2   : > { %v806_v5 = vpop.f32.mrf.mxu0 }
 0x1c3   : > { %924 = vadd.xlane.f32.xlu1 %v892_v30  ;;  %v900_v45 = vsub.f32 %v892_v30, %v806_v5 }
 0x1c5   : > { %v908_v57 = vmul.f32 0.5, %v900_v45 }
 0x1c7   : > { %v2485_v37 = vadd.f32 %v908_v57, %v884_v41 }
 0x1c9   : > { %v940_v38 = vmul.f32 %v2485_v37, %v2485_v37 }
 0x1d3   : > { %v810_v31 = vpop.f32.mrf.mxu0 }
 0x1d4   : > { %v893_v12 = vmul.f32 %v810_v31, %v810_v31  ;;  %v1080_v32 = vpack.c.bf16 %v810_v31, %v804_v15 }
 0x1d5   : > { %v812_v35 = vpop.f32.mrf.mxu0 }
 0x1d6   : > { %1522 = vmatprep.mubr.bf16.mxu1 %v1080_v32  ;;  %926 = vadd.xlane.f32.xlu0 %v893_v12  ;;  %v901_v16 = vsub.f32 %v893_v12, %v812_v35 }
 0x1d8   : > { %v909_v7 = vmul.f32 0.5, %v901_v16 }
 0x1da   : > { %v2490_v44 = vadd.f32 %v909_v7, %v885_v43 }
 0x1dc   : > { %v941_v24 = vmul.f32 %v2490_v44, %v2490_v44 }
 0x1df   : > { %v816_v36 = vpop.f32.mrf.mxu0 }
 0x1e0   : > { %v894_v55 = vmul.f32 %v816_v36, %v816_v36 }
 0x1e1   : > { %v818_v42 = vpop.f32.mrf.mxu0 }
 0x1e2   : > { %928 = vadd.xlane.f32.xlu1 %v894_v55  ;;  %v902_v47 = vsub.f32 %v894_v55, %v818_v42  ;;  %v1708_v42 = vld [vmem:[#allocation3 + $0x10] sm:$0xff]  }
 0x1e4   : > { %v910_v48 = vmul.f32 0.5, %v902_v47 }
 0x1e6   : > { %948 = vadd.xlane.f32.xlu1 %v940_v38  ;;  %v2495_v51 = vadd.f32 %v910_v48, %v886_v50 }
 0x1e8   : > { %v942_v54 = vmul.f32 %v2495_v51, %v2495_v51 }
 0x1ee   : > { %v875_v56 = vpop.xlane.xlu0 %874 }
 0x1ef   : > { %v888_v19 = vadd.f32 %v2482_v33, %v875_v56 }
 0x202   : > { %v877_v11 = vpop.xlane.xlu0 %876 }
 0x203   : > { %v889_v27 = vadd.f32 %v2482_v33, %v877_v11 }
 0x206   : > { %v873_v8 = vpop.xlane.xlu0 %872 }
 0x207   : > { %v887_v63 = vadd.f32 %v2482_v33, %v873_v8 }
 0x20a   : > { %v822_v9 = vpop.f32.mrf.mxu0 }
 0x20b   : > { %v895_v0 = vmul.f32 %v822_v9, %v822_v9  ;;  %v1081_v46 = vpack.c.bf16 %v822_v9, %v816_v36  ;;  %v1707_v36 = vld [vmem:[#allocation3 + $0x18] sm:$0xff]   ;;  %v1710_v9 = vld [vmem:[#allocation3] sm:$0xff]  }
 0x20c   : > { %v824_v49 = vpop.f32.mrf.mxu0  ;;  %1538 = vmatprep.subr.bf16.mxu0 %v1707_v36 }
 0x20d   : > { %1523 = vmatmul.mubr.bf16.vlgmr.msra.gmra.mxu1 %v1081_v46  ;;  %930 = vadd.xlane.f32.xlu0 %v895_v0  ;;  %v903_v58 = vsub.f32 %v895_v0, %v824_v49 }
 0x20e   : > { %1562 = vmatpush3.bf16.msra.mxu1 %v1703_v3  ;;  %1539 = vmatpush3.bf16.msra.mxu0 %v1707_v36 }
 0x20f   : > { %v911_v60 = vmul.f32 0.5, %v903_v58  ;;  %1555 = vmatprep.subr.bf16.mxu1 %v1704_v18  ;;  %1540 = vmatprep.subr.bf16.mxu0 %v1708_v42 }
 0x211   : > { %950 = vadd.xlane.f32.xlu0 %v941_v24  ;;  %v2500_v6 = vadd.f32 %v911_v60, %v887_v63  ;;  %v879_v21 = vpop.xlane.xlu1 %878 }
 0x212   : > { %1563 = vmatpush3.bf16.msra.mxu1 %v1704_v18  ;;  %v890_v15 = vadd.f32 %v2482_v33, %v879_v21  ;;  %1541 = vmatpush3.bf16.msra.mxu0 %v1708_v42 }
 0x213   : > { %v943_v40 = vmul.f32 %v2500_v6, %v2500_v6  ;;  %1556 = vmatprep.subr.bf16.mxu1 %v1705_v1 }
 0x215   : > { %v881_v45 = vpop.xlane.xlu0 %880 }
 0x216   : > { %1564 = vmatpush3.bf16.msra.mxu1 %v1705_v1  ;;  %v891_v55 = vadd.f32 %v2482_v33, %v881_v45  ;;  %v1709_v33 = vld [vmem:[#allocation3 + $0x8] sm:$0xff]  }
 0x217   : > { %1557 = vmatprep.subr.bf16.mxu1 %v1706_v29  ;;  %1542 = vmatprep.subr.bf16.mxu0 %v1709_v33 }
 0x218   : > { %1543 = vmatpush3.bf16.msra.mxu0 %v1709_v33 }
 0x219   : > { %1544 = vmatprep.subr.bf16.mxu0 %v1710_v9 }
 0x21a   : > { %1565 = vmatpush3.bf16.msra.mxu1 %v1706_v29 }
 0x21b   : > { %1558 = vmatprep.subr.bf16.mxu1 %v1707_v36 }
 0x21c   : > { %1545 = vmatpush3.bf16.msra.mxu0 %v1710_v9 }
 0x21e   : > { %1566 = vmatpush3.bf16.msra.mxu1 %v1707_v36 }
 0x21f   : > { %1559 = vmatprep.subr.bf16.mxu1 %v1708_v42 }
 0x222   : > { %1567 = vmatpush3.bf16.msra.mxu1 %v1708_v42 }
 0x223   : > { %v828_v52 = vpop.f32.mrf.mxu0  ;;  %1560 = vmatprep.subr.bf16.mxu1 %v1709_v33 }
 0x224   : > { %v896_v53 = vmul.f32 %v828_v52, %v828_v52 }
 0x225   : > { %v830_v62 = vpop.f32.mrf.mxu0 }
 0x226   : > { %932 = vadd.xlane.f32.xlu1 %v896_v53  ;;  %v904_v14 = vsub.f32 %v896_v53, %v830_v62  ;;  %1568 = vmatpush3.bf16.msra.mxu1 %v1709_v33 }
 0x227   : > { %1561 = vmatprep.subr.bf16.mxu1 %v1710_v9 }
 0x228   : > { %v912_v23 = vmul.f32 0.5, %v904_v14 }
 0x22a   : > { %952 = vadd.xlane.f32.xlu1 %v942_v54  ;;  %v2505_v25 = vadd.f32 %v912_v23, %v888_v19  ;;  %1569 = vmatpush3.bf16.msra.mxu1 %v1710_v9 }
 0x22c   : > { %v944_v57 = vmul.f32 %v2505_v25, %v2505_v25 }
 0x237   : > { %v834_v4 = vpop.f32.mrf.mxu0 }
 0x238   : > { %v897_v2 = vmul.f32 %v834_v4, %v834_v4  ;;  %v1082_v13 = vpack.c.bf16 %v834_v4, %v828_v52 }
 0x239   : > { %v836_v17 = vpop.f32.mrf.mxu0 }
 0x23a   : > { %1526 = vmatprep.mubr.bf16.mxu1 %v1082_v13  ;;  %934 = vadd.xlane.f32.xlu0 %v897_v2  ;;  %v905_v59 = vsub.f32 %v897_v2, %v836_v17 }
 0x23c   : > { %v913_v22 = vmul.f32 0.5, %v905_v59 }
 0x23e   : > { %954 = vadd.xlane.f32.xlu0 %v943_v40  ;;  %v2509_v5 = vadd.f32 %v913_v22, %v889_v27 }
 0x240   : > { %v945_v16 = vmul.f32 %v2509_v5, %v2509_v5 }
 0x246   : > { %v840_v20 = vpop.f32.mrf.mxu0 }
 0x247   : > { %v898_v10 = vmul.f32 %v840_v20, %v840_v20 }
 0x248   : > { %v842_v26 = vpop.f32.mrf.mxu0 }
 0x249   : > { %v906_v28 = vsub.f32 %v898_v10, %v842_v26  ;;  %936 = vadd.xlane.f32.xlu1 %v898_v10 }
 0x24a   : > { %v846_v30 = vpop.f32.mrf.mxu0 }
 0x24b   : > { %v914_v31 = vmul.f32 0.5, %v906_v28  ;;  %v899_v12 = vmul.f32 %v846_v30, %v846_v30  ;;  %v1083_v32 = vpack.c.bf16 %v846_v30, %v840_v20 }
 0x24c   : > { %v848_v34 = vpop.f32.mrf.mxu0  ;;  %v925_v0 = vpop.xlane.xlu1 %924 }
 0x24d   : > { %v2513_v35 = vadd.f32 %v914_v31, %v890_v15  ;;  %v907_v41 = vsub.f32 %v899_v12, %v848_v34  ;;  %1527 = vmatmul.mubr.bf16.gmra.mxu1 %v1083_v32  ;;  %938 = vadd.xlane.f32.xlu0 %v899_v12  ;;  %v964_v47 = vmax.f32 %v925_v0, 1e-09 }
 0x24e   : > { %956 = vadd.xlane.f32.xlu1 %v944_v57 }
 0x24f   : > { %v915_v38 = vmul.f32 0.5, %v907_v41  ;;  %v946_v39 = vmul.f32 %v2513_v35, %v2513_v35  ;;  %1711 = vrsqrt.f32 %v964_v47  ;;  %vm974_vm0 = vcmp.eq.f32.partialorder %v964_v47, inf }
 0x250   : > { %v977_v62 = vand.u32 2147483648, %v964_v47  ;;  %vm976_vm2 = vcmp.eq.f32.partialorder %v964_v47, 0.0 }
 0x251   : > { %v2520_v7 = vadd.f32 %v915_v38, %v891_v55  ;;  %958 = vadd.xlane.f32.xlu0 %v945_v16 }
 0x252   : > { %960 = vadd.xlane.f32.xlu1 %v946_v39 }
 0x253   : > { %v947_v43 = vmul.f32 %v2520_v7, %v2520_v7 }
 0x255   : > { %962 = vadd.xlane.f32.xlu0 %v947_v43 }
 0x25c   : > { %v1712_v54 = vpop.eup %1711 }
 0x25d   : > { %v973_v11 = vmul.f32 %v1712_v54, %v964_v47 }
 0x25f   : > { %v927_v46 = vpop.xlane.xlu0 %926  ;;  %v975_v8 = vsel %vm974_vm0, %v964_v47, %v973_v11 }
 0x260   : > { %v965_v61 = vmax.f32 %v927_v46, 1e-09  ;;  %v978_v4 = vsel %vm976_vm2, %v977_v62, %v975_v8 }
 0x262   : > { %1713 = vrsqrt.f32 %v965_v61  ;;  %vm981_vm1 = vcmp.eq.f32.partialorder %v965_v61, inf  ;;  %v984_v2 = vand.u32 2147483648, %v965_v61  ;;  %vm983_vm3 = vcmp.eq.f32.partialorder %v965_v61, 0.0 }
 0x26b   : > { %v929_v24 = vpop.xlane.xlu1 %928 }
 0x26c   : > { %v966_v1 = vmax.f32 %v929_v24, 1e-09 }
 0x26e   : > { %vm988_vm4 = vcmp.eq.f32.partialorder %v966_v1, inf  ;;  %v991_v32 = vand.u32 2147483648, %v966_v1  ;;  %vm990_vm6 = vcmp.eq.f32.partialorder %v966_v1, 0.0 }
 0x26f   : > { %v949_v48 = vpop.xlane.xlu1 %948  ;;  %v1714_v56 = vpop.eup %1713 }
 0x270   : > { %v1028_v49 = vmax.f32 %v949_v48, 1e-09  ;;  %v980_v58 = vmul.f32 %v1714_v56, %v965_v61 }
 0x272   : > { %1715 = vrsqrt.f32 %v1028_v49  ;;  %v982_v63 = vsel %vm981_vm1, %v965_v61, %v980_v58 }
 0x273   : > { %v985_v3 = vsel %vm983_vm3, %v984_v2, %v982_v63 }
 0x27f   : > { %v1716_v60 = vpop.eup %1715 }
 0x280   : > { %v1044_v13 = vmul.f32 %v1716_v60, %v978_v4 }
 0x282   : > { %v1052_v17 = vmul.f32 %v1044_v13, %v2485_v37 }
 0x296   : > { %v931_v50 = vpop.xlane.xlu0 %930 }
 0x297   : > { %v967_v19 = vmax.f32 %v931_v50, 1e-09 }
 0x299   : > { %vm995_vm5 = vcmp.eq.f32.partialorder %v967_v19, inf  ;;  %v998_v57 = vand.u32 2147483648, %v967_v19  ;;  %vm997_vm7 = vcmp.eq.f32.partialorder %v967_v19, 0.0 }
 0x29a   : > { %v951_v52 = vpop.xlane.xlu0 %950 }
 0x29b   : > { %v1029_v53 = vmax.f32 %v951_v52, 1e-09 }
 0x29d   : > { %1717 = vrsqrt.f32 %v1029_v53 }
 0x29e   : > { %1719 = vrsqrt.f32 %v966_v1 }
 0x29f   : > { %1721 = vrsqrt.f32 %v967_v19 }
 0x2aa   : > { %v1718_v40 = vpop.eup %1717 }
 0x2ab   : > { %v1045_v14 = vmul.f32 %v1718_v40, %v985_v3  ;;  %v1720_v27 = vpop.eup %1719 }
 0x2ac   : > { %v1722_v28 = vpop.eup %1721  ;;  %v987_v37 = vmul.f32 %v1720_v27, %v966_v1 }
 0x2ad   : > { %v1053_v18 = vmul.f32 %v1045_v14, %v2490_v44  ;;  %v994_v44 = vmul.f32 %v1722_v28, %v967_v19 }
 0x2ae   : > { %v989_v30 = vsel %vm988_vm4, %v966_v1, %v987_v37 }
 0x2af   : > { %v1060_v59 = vpack.c.bf16 %v1053_v18, %v1052_v17  ;;  %v933_v23 = vpop.xlane.xlu1 %932  ;;  %v996_v34 = vsel %vm995_vm5, %v967_v19, %v994_v44  ;;  %v992_v41 = vsel %vm990_vm6, %v991_v32, %v989_v30 }
 0x2b0   : > { %v968_v29 = vmax.f32 %v933_v23, 1e-09  ;;  %v999_v16 = vsel %vm997_vm7, %v998_v57, %v996_v34 }
 0x2b1   : > { %1546 = vmatprep.mubr.bf16.mxu0 %v1060_v59 }
 0x2b2   : > { %vm1002_vm8 = vcmp.eq.f32.partialorder %v968_v29, inf  ;;  %v1005_v8 = vand.u32 2147483648, %v968_v29  ;;  %vm1004_vm10 = vcmp.eq.f32.partialorder %v968_v29, 0.0 }
 0x2b3   : > { %v953_v20 = vpop.xlane.xlu1 %952 }
 0x2b4   : > { %v1030_v21 = vmax.f32 %v953_v20, 1e-09 }
 0x2b6   : > { %1723 = vrsqrt.f32 %v1030_v21 }
 0x2c3   : > { %v935_v22 = vpop.xlane.xlu0 %934  ;;  %v1724_v12 = vpop.eup %1723 }
 0x2c4   : > { %v2526_v15 = vmax.f32 %v935_v22, 1e-09  ;;  %v1046_v36 = vmul.f32 %v1724_v12, %v992_v41 }
 0x2c6   : > { %v1054_v0 = vmul.f32 %v1046_v36, %v2495_v51  ;;  %vm1009_vm9 = vcmp.eq.f32.partialorder %v2526_v15, inf  ;;  %v1012_v2 = vand.u32 2147483648, %v2526_v15  ;;  %vm1011_vm12 = vcmp.eq.f32.partialorder %v2526_v15, 0.0 }
 0x2c7   : > { %v955_v10 = vpop.xlane.xlu0 %954 }
 0x2c8   : > { %v1031_v26 = vmax.f32 %v955_v10, 1e-09 }
 0x2ca   : > { %1725 = vrsqrt.f32 %v1031_v26 }
 0x2cb   : > { %1727 = vrsqrt.f32 %v968_v29 }
 0x2cc   : > { %1729 = vrsqrt.f32 %v2526_v15 }
 0x2cd   : > { %v1524_v44 = vpop.f32.mrf.mxu1 }
 0x2cf   : > { %v1182_v30 = vpop.f32.mrf.mxu1 }
 0x2d1   : > { %v1525_v12 = vpop.f32.mrf.mxu1 }
 0x2d2   : > { %v937_v31 = vpop.xlane.xlu1 %936 }
 0x2d3   : > { %v970_v45 = vmax.f32 %v937_v31, 1e-09  ;;  %v1185_v41 = vpop.f32.mrf.mxu1 }
 0x2d5   : > { %1731 = vrsqrt.f32 %v970_v45  ;;  %vm1016_vm11 = vcmp.eq.f32.partialorder %v970_v45, inf  ;;  %v1019_v14 = vand.u32 2147483648, %v970_v45  ;;  %vm1018_vm14 = vcmp.eq.f32.partialorder %v970_v45, 0.0 }
 0x2d6   : > { %v939_v55 = vpop.xlane.xlu0 %938 }
 0x2d7   : > { %v1726_v38 = vpop.eup %1725  ;;  %v971_v39 = vmax.f32 %v939_v55, 1e-09  ;;  %v957_v42 = vpop.xlane.xlu1 %956 }
 0x2d8   : > { %v1047_v43 = vmul.f32 %v1726_v38, %v999_v16  ;;  %v1032_v33 = vmax.f32 %v957_v42, 1e-09  ;;  %v1728_v49 = vpop.eup %1727 }
 0x2d9   : > { %1733 = vrsqrt.f32 %v971_v39  ;;  %v1730_v53 = vpop.eup %1729  ;;  %v1001_v54 = vmul.f32 %v1728_v49, %v968_v29  ;;  %vm1023_vm13 = vcmp.eq.f32.partialorder %v971_v39, inf  ;;  %v1026_v1 = vand.u32 2147483648, %v971_v39 }
 0x2da   : > { %1735 = vrsqrt.f32 %v1032_v33  ;;  %v959_v9 = vpop.xlane.xlu0 %958  ;;  %v1055_v46 = vmul.f32 %v1047_v43, %v2500_v6  ;;  %v1008_v11 = vmul.f32 %v1730_v53, %v2526_v15  ;;  %vm1025_vm15 = vcmp.eq.f32.partialorder %v971_v39, 0.0 }
 0x2db   : > { %v1033_v24 = vmax.f32 %v959_v9, 1e-09  ;;  %v961_v47 = vpop.xlane.xlu1 %960  ;;  %v1003_v58 = vsel %vm1002_vm8, %v968_v29, %v1001_v54 }
 0x2dc   : > { %v1034_v61 = vmax.f32 %v961_v47, 1e-09  ;;  %v1061_v48 = vpack.c.bf16 %v1055_v46, %v1054_v0  ;;  %v1010_v63 = vsel %vm1009_vm9, %v2526_v15, %v1008_v11  ;;  %v1006_v4 = vsel %vm1004_vm10, %v1005_v8, %v1003_v58 }
 0x2dd   : > { %1737 = vrsqrt.f32 %v1033_v24  ;;  %v1013_v17 = vsel %vm1011_vm12, %v1012_v2, %v1010_v63 }
 0x2de   : > { %1739 = vrsqrt.f32 %v1034_v61  ;;  %v963_v50 = vpop.xlane.xlu0 %962  ;;  %1547 = vmatmul.mubr.bf16.vlgmr.msra.gmra.mxu0 %v1061_v48 }
 0x2df   : > { %v1035_v52 = vmax.f32 %v963_v50, 1e-09 }
 0x2e1   : > { %1741 = vrsqrt.f32 %v1035_v52 }
 0x2e2   : > { %v1732_v56 = vpop.eup %1731 }
 0x2e3   : > { %v1015_v51 = vmul.f32 %v1732_v56, %v970_v45 }
 0x2e5   : > { %v1017_v13 = vsel %vm1016_vm11, %v970_v45, %v1015_v51 }
 0x2e6   : > { %v1734_v6 = vpop.eup %1733  ;;  %v1020_v19 = vsel %vm1018_vm14, %v1019_v14, %v1017_v13 }
 0x2e7   : > { %v1736_v60 = vpop.eup %1735  ;;  %v1022_v62 = vmul.f32 %v1734_v6, %v971_v39 }
 0x2e8   : > { %v1048_v40 = vmul.f32 %v1736_v60, %v1006_v4 }
 0x2e9   : > { %v1024_v59 = vsel %vm1023_vm13, %v971_v39, %v1022_v62 }
 0x2ea   : > { %v1738_v3 = vpop.eup %1737  ;;  %v1056_v21 = vmul.f32 %v1048_v40, %v2505_v25  ;;  %v1027_v26 = vsel %vm1025_vm15, %v1026_v1, %v1024_v59  ;;  %v1475_v25 = vld [vmem:[%s2613_s6] ss:$0 sm:$0xff] }
 0x2eb   : > { %v1740_v18 = vpop.eup %1739  ;;  %v1049_v23 = vmul.f32 %v1738_v3, %v1013_v17 }
 0x2ec   : > { %v1050_v20 = vmul.f32 %v1740_v18, %v1020_v19 }
 0x2ed   : > { %v1057_v22 = vmul.f32 %v1049_v23, %v2509_v5 }
 0x2ee   : > { %v1742_v10 = vpop.eup %1741  ;;  %v1058_v29 = vmul.f32 %v1050_v20, %v2513_v35 }
 0x2ef   : > { %v1051_v27 = vmul.f32 %v1742_v10, %v1027_v26  ;;  %v1062_v28 = vpack.c.bf16 %v1057_v22, %v1056_v21 }
 0x2f1   : > { %1550 = vmatprep.mubr.bf16.mxu1 %v1062_v28  ;;  %v1059_v37 = vmul.f32 %v1051_v27, %v2520_v7 }
 0x2f3   : > { %v1063_v15 = vpack.c.bf16 %v1059_v37, %v1058_v29 }
 0x2f5   : > { %1551 = vmatmul.mubr.bf16.vlgmr.msra.gmra.mxu1 %v1063_v15 }
 0x30d   : > { %v1528_v16 = vpop.f32.mrf.mxu1 }
 0x30f   : > { %v1198_v42 = vpop.f32.mrf.mxu1 }
 0x311   : > { %v1529_v43 = vpop.f32.mrf.mxu1 }
 0x313   : > { %v1201_v33 = vpop.f32.mrf.mxu1 }
 0x39e   : > { %v1548_v31 = vpop.f32.mrf.mxu0 }
 0x39f   : > { %v1304_v5 = vadd.f32 %v1548_v31, %v1524_v44 }
 0x3a0   : > { %v1295_v32 = vpop.f32.mrf.mxu0 }
 0x3a1   : > { %v1335_v45 = vadd.f32 %v1475_v25, %v1304_v5  ;;  %v1296_v34 = vadd.f32 %v1295_v32, %v1182_v30 }
 0x3a2   : > { %v1549_v35 = vpop.f32.mrf.mxu0 }
 0x3a3   : > { %1343 = vst [vmem:[%s2546_s17 + $0x10] sm:$0xff] %v1335_v45  ;;  %v1333_v7 = vadd.f32 %v1475_v25, %v1296_v34  ;;  %v1307_v57 = vadd.f32 %v1549_v35, %v1525_v12 }
 0x3a4   : > { %v1298_v36 = vpop.f32.mrf.mxu0 }
 0x3a5   : > { %1341 = vst [vmem:[%s2546_s17] sm:$0xff] %v1333_v7  ;;  %v1336_v55 = vadd.f32 %v1475_v25, %v1307_v57  ;;  %v1299_v38 = vadd.f32 %v1298_v36, %v1185_v41 }
 0x3a7   : > { %1344 = vst [vmem:[%s2546_s17 + $0x18] sm:$0xff] %v1336_v55  ;;  %v1334_v39 = vadd.f32 %v1475_v25, %v1299_v38 }
 0x3a9   : > { %1342 = vst [vmem:[%s2546_s17 + $0x8] sm:$0xff] %v1334_v39 }
 0x3b5   : > { %v1552_v9 = vpop.f32.mrf.mxu1 }
 0x3b6   : > { %v1320_v0 = vadd.f32 %v1552_v9, %v1528_v16 }
 0x3b7   : > { %v1311_v46 = vpop.f32.mrf.mxu1 }
 0x3b8   : > { %v1339_v24 = vadd.f32 %v1475_v25, %v1320_v0  ;;  %v1312_v47 = vadd.f32 %v1311_v46, %v1198_v42 }
 0x3b9   : > { %v1553_v61 = vpop.f32.mrf.mxu1 }
 0x3ba   : > { %1347 = vst [vmem:[%s2546_s17 + $0x30] sm:$0xff] %v1339_v24  ;;  %v1337_v48 = vadd.f32 %v1475_v25, %v1312_v47  ;;  %v1323_v49 = vadd.f32 %v1553_v61, %v1529_v43 }
 0x3bb   : > { %v1314_v50 = vpop.f32.mrf.mxu1 }
 0x3bc   : > { %1345 = vst [vmem:[%s2546_s17 + $0x20] sm:$0xff] %v1337_v48  ;;  %v1340_v52 = vadd.f32 %v1475_v25, %v1323_v49  ;;  %v1315_v53 = vadd.f32 %v1314_v50, %v1201_v33 }
 0x3be   : > { %1348 = vst [vmem:[%s2546_s17 + $0x38] sm:$0xff] %v1340_v52  ;;  %v1338_v54 = vadd.f32 %v1475_v25, %v1315_v53 }
 0x3c0   : > { %1346 = vst [vmem:[%s2546_s17 + $0x28] sm:$0xff] %v1338_v54 }
 0x3c1   : > { %1808 = shalt.err (!%p1805_p3)
}
 0x3c2   : > { %s1809_s9 = scalar_lea.hbm %s2562_s22, 1024  ;;  %s1813_s15 = scalar_lea.hbm %s2614_s7, 4096 }
 0x3c3   : > { %p1810_p2 = scmp.ne.s32.totalorder %s2562_s22, %s1809_s9  ;;  %p1814_p7 = scmp.lt.s32.totalorder %s2562_s22, %s2614_s7 }
 0x3c4   : > { %p1815_p6 = scmp.lt.s32.totalorder %s1813_s15, %s1809_s9 }
 0x3c5   : > { %p1811_p4 = pnand %p1810_p2, %p1962_p5 }
 0x3c6   : > { %p1816_p9 = por %p1815_p6, %p1814_p7 }
 0x3c7   : > { %p1812_p13 = pneg %p1811_p4 }
 0x3c9   : > { %p1817_p10 = pnand %p1816_p9, %p1812_p13 }
 0x3cb   : > { %1820 = shalt.err (!%p1817_p10)
}
 0x3cc   : > { %s1879_s19 = smov 128   ;;  %s1880_s20 = smov 8  }
 0x3cd   : > { %1578 = dma.vmem_to_hbm [thread:$0]  (%p1962_p5), %s2556_s18, 1024, %s2562_s22, %s2567_s23, %s1879_s19, %s1879_s19, %s1880_s20  }
 0x3ce PF: > { %p1595_p12 = scmp.ge.s32.totalorder %s1863_s29, 2  ;;  %s1378_s21 = sand.u32 1, %s1851_s26  }
 0x3cf   : > { %p2624_p8 = scmp.ne.s32.totalorder %s2617_s13, 0  ;;  %s1379_s3 = scalar_lea.sflag [#allocation5], %s1378_s21 }
 0x3d1   : > { %p1588_p11 = pnand %p1595_p12, %p2624_p8 }
 0x3d3   : > { %p1589_p0 = pneg %p1588_p11 }
 0x3d5   : > { %1846 = dma.done.wait (%p1589_p0), %s1379_s3, 1024  }
 0x3d6   : > { %1848 = vsyncadd (%p1589_p0), %s1379_s3, 4294966272  ;;  %p20_p1 = scmp.ge.s32.totalorder %s1949_s8, 6   ;;  %s2625_s26 = smov %s1855_s27 }
 0x3d7   : > { %s2626_s27 = smov %s1859_s28  ;;  %s2627_s28 = smov %s1960_s11 }
 0x3d8   : > { %s2628_s29 = smov %s1949_s8  ;;  %22 = sbr.rel (!%p20_p1) target bundleno = 7 (0x7), region = 92 }
 0x3dd   :  { %1384 = vsyncpa [#allocation4], 1 }
 0x3de   :  { %1386 = vsyncpa [#allocation4 + $0x1], 1 }
 0x3df   :  { %1387 = vsyncpa [#allocation7], 1 }
 0x3e0   :  { %1388 = vsyncpa [#allocation5], 1 }
 0x3e1   :  { %1390 = vsyncpa [#allocation5 + $0x1], 1 }

</bundles_post_ra>
